<compile_context>
chip_gen: v7x
topology: tpu7x:2x2x1
jax: 0.10.0
libtpu: 0.0.40
codegen_flags: <defaults>
</compile_context>

<pallas_src>
import functools

import jax
import jax.numpy as jnp
from jax.experimental import pallas as pl
from jax.experimental.pallas import tpu as pltpu


_VMEM_LIMIT = 48 * 1024 * 1024  # leave headroom under v7x's 64 MiB VMEM


# ----------------------------------------------------------------------------
# Tile-size helper
# ----------------------------------------------------------------------------
def _pick_tile(M, t_max=512):
    """Row tile: multiple of 8, <= t_max, and >= 2 grid blocks when possible."""
    if M % 8 != 0:
        return M                      # tiny ragged case -> full-array block
    if M >= 2 * t_max:
        return t_max
    return min(t_max, max(8, (M // 2) // 8 * 8))


# ----------------------------------------------------------------------------
# Pallas kernel 1: fused (X @ W + bias) -> activation   (bf16 in, f32 acc)
# ----------------------------------------------------------------------------
def _matmul_bias_act_kernel(x_ref, w_ref, b_ref, o_ref, *, act):
    y = jnp.dot(x_ref[...], w_ref[...], preferred_element_type=jnp.float32)
    y = y + b_ref[...]
    if act == "relu":
        y = jnp.maximum(y, 0.0)
    elif act == "tanh":
        y = jnp.tanh(y)
    o_ref[...] = y.astype(o_ref.dtype)


def matmul_bias_act(x, w, b_row, act, tm_max=512):
    """act(x @ w + b_row): x [M, K], w [K, N], b_row [1, N] -> f32 [M, N]."""
    M, K = x.shape
    Kw, N = w.shape
    assert K == Kw
    x = x.astype(jnp.bfloat16)            # MXU-native inputs, f32 accumulation
    w = w.astype(jnp.bfloat16)
    b_row = b_row.astype(jnp.float32)

    tm = _pick_tile(M, tm_max)
    grid = (pl.cdiv(M, tm),)              # no HBM pad pass; ragged block OK

    return pl.pallas_call(
        functools.partial(_matmul_bias_act_kernel, act=act),
        out_shape=jax.ShapeDtypeStruct((M, N), jnp.float32),
        grid=grid,
        in_specs=[
            pl.BlockSpec((tm, K), lambda i: (i, 0)),   # X row tile
            pl.BlockSpec((K, N), lambda i: (0, 0)),    # full weight, resident
            pl.BlockSpec((1, N), lambda i: (0, 0)),    # bias row
        ],
        out_specs=pl.BlockSpec((tm, N), lambda i: (i, 0)),
        compiler_params=pltpu.CompilerParams(
            dimension_semantics=("parallel",),
            vmem_limit_bytes=_VMEM_LIMIT),
    )(x, w, b_row)


# ----------------------------------------------------------------------------
# Pallas kernel 2: lane-dense bias + activation epilogue (post col2im)
# ----------------------------------------------------------------------------
def _bias_act_kernel(x_ref, b_ref, o_ref, *, act):
    y = x_ref[...] + b_ref[...]
    if act == "relu":
        y = jnp.maximum(y, 0.0)
    elif act == "tanh":
        y = jnp.tanh(y)
    o_ref[...] = y.astype(o_ref.dtype)


def bias_act_2d(x2d, b_row, act, tr_max=512):
    """act(x2d + b_row): x2d [R, C], b_row [1, C] -> f32 [R, C]."""
    R, C = x2d.shape
    tr = _pick_tile(R, tr_max)
    return pl.pallas_call(
        functools.partial(_bias_act_kernel, act=act),
        out_shape=jax.ShapeDtypeStruct((R, C), jnp.float32),
        grid=(pl.cdiv(R, tr),),
        in_specs=[
            pl.BlockSpec((tr, C), lambda i: (i, 0)),
            pl.BlockSpec((1, C), lambda i: (0, 0)),
        ],
        out_specs=pl.BlockSpec((tr, C), lambda i: (i, 0)),
        compiler_params=pltpu.CompilerParams(
            dimension_semantics=("parallel",),
            vmem_limit_bytes=_VMEM_LIMIT),
    )(x2d.astype(jnp.float32), b_row.astype(jnp.float32))


# ----------------------------------------------------------------------------
# ConvTranspose2d = (X @ W[Cin, KH*KW*Cout]) + col2im overlap-add + bias/act
# ----------------------------------------------------------------------------
def conv_transpose2d(x_nhwc, w_pt, bias, stride, padding, act):
    """x_nhwc: [N,H,W,Cin]; w_pt: PyTorch ConvTranspose2d weight [Cin,Cout,KH,KW]."""
    cin, cout, kh, kw = w_pt.shape
    n, h, w, cin2 = x_nhwc.shape
    assert cin == cin2

    # Weight: [Cin, Cout, KH, KW] -> [Cin, KH*KW*Cout]  (ki, kj, co ordering).
    w_flat = jnp.transpose(w_pt, (0, 2, 3, 1)).reshape(cin, kh * kw * cout)
    x2d = x_nhwc.reshape(n * h * w, cin)

    if h == 1 and w == 1 and padding == 0:
        # Layer-0 special case: 1x1 spatial input -> pure dense matmul,
        # no overlaps, so bias + activation fuse directly into the kernel.
        b_tiled = jnp.tile(bias, kh * kw).reshape(1, kh * kw * cout)
        cols = matmul_bias_act(x2d, w_flat, b_tiled, act)
        return cols.reshape(n, kh, kw, cout)

    # Hot path: lane-dense matmul (N = KH*KW*Cout), bias/act deferred.
    zero_b = jnp.zeros((1, kh * kw * cout), jnp.float32)
    cols = matmul_bias_act(x2d, w_flat, zero_b, "none")
    cols = cols.reshape(n, h, w, kh, kw, cout)

    # col2im overlap-add: out[n, ih*s - p + ki, iw*s - p + kj, co] += cols[...]
    # TODO(synk): the strided scatter-add below is plain-JAX glue; fusing it
    # into the Pallas kernel would need a halo'd accumulator scratch.
    hp = (h - 1) * stride + kh
    wp = (w - 1) * stride + kw
    out_pad = jnp.zeros((n, hp, wp, cout), jnp.float32)
    for ki in range(kh):
        for kj in range(kw):
            out_pad = out_pad.at[
                :, ki:ki + (h - 1) * stride + 1:stride,
                kj:kj + (w - 1) * stride + 1:stride, :].add(cols[:, :, :, ki, kj, :])

    h_out = (h - 1) * stride - 2 * padding + kh
    w_out = (w - 1) * stride - 2 * padding + kw
    out = out_pad[:, padding:padding + h_out, padding:padding + w_out, :]

    # Lane-dense epilogue: [N*H_out, W_out*Cout] with a W_out-tiled bias row.
    out2d = out.reshape(n * h_out, w_out * cout)
    b_tiled = jnp.tile(bias, w_out).reshape(1, w_out * cout)
    out2d = bias_act_2d(out2d, b_tiled, act)
    return out2d.reshape(n, h_out, w_out, cout)


# ----------------------------------------------------------------------------
# Generator: 4 x (ConvTranspose + ReLU), final ConvTranspose + Tanh
# ----------------------------------------------------------------------------
_STRIDES = (1, 2, 2, 2, 2)
_PADDINGS = (0, 1, 1, 1, 1)


def init_generator_params(key, channels_noise, channels_img, features_g):
    # (in_ch, out_ch, has_bias) — stride/padding come from _STRIDES/_PADDINGS.
    cfg = [
        (channels_noise, features_g * 8, False),
        (features_g * 8, features_g * 4, False),
        (features_g * 4, features_g * 2, False),
        (features_g * 2, features_g,     False),
        (features_g,     channels_img,   True),
    ]
    params = []
    for (cin, cout, has_b) in cfg:
        key, wk = jax.random.split(key)
        w = (0.02 * jax.random.normal(wk, (cin, cout, 4, 4))).astype(jnp.float32)
        if has_b:
            key, bk = jax.random.split(key)
            b = (0.02 * jax.random.normal(bk, (cout,))).astype(jnp.float32)
        else:
            b = jnp.zeros((cout,), jnp.float32)
        params.append({"w": w, "b": b})
    return params


def generator_forward(params, x_nchw):
    # NCHW -> NHWC for the internal pipeline.
    x = jnp.transpose(x_nchw, (0, 2, 3, 1)).astype(jnp.float32)
    n_layers = len(params)
    for li, layer in enumerate(params):
        act = "tanh" if li == n_layers - 1 else "relu"
        x = conv_transpose2d(x, layer["w"], layer["b"],
                             _STRIDES[li], _PADDINGS[li], act)
    return jnp.transpose(x, (0, 3, 1, 2))  # back to NCHW like PyTorch


# ----------------------------------------------------------------------------
# Pure-JAX f32 reference (independent formulation: zero-upsample + im2col)
# ----------------------------------------------------------------------------
def _ref_conv_transpose2d(x_nhwc, w_pt, bias, stride, padding):
    cin, cout, kh, kw = w_pt.shape
    n, h, w, _ = x_nhwc.shape
    if stride > 1:
        up = jnp.zeros((n, (h - 1) * stride + 1, (w - 1) * stride + 1, cin),
                       x_nhwc.dtype)
        up = up.at[:, ::stride, ::stride, :].set(x_nhwc)
    else:
        up = x_nhwc
    pad = kh - 1 - padding
    xp = jnp.pad(up, ((0, 0), (pad, pad), (pad, pad), (0, 0)))
    h_out = (h - 1) * stride - 2 * padding + kh
    w_out = (w - 1) * stride - 2 * padding + kw
    patches = []
    for i in range(kh):
        for j in range(kw):
            patches.append(xp[:, i:i + h_out, j:j + w_out, :])
    p = jnp.concatenate(patches, axis=-1).reshape(n * h_out * w_out, kh * kw * cin)
    w_conv = jnp.flip(jnp.transpose(w_pt, (2, 3, 0, 1)), axis=(0, 1))
    out = p @ w_conv.reshape(kh * kw * cin, cout) + bias.reshape(1, cout)
    return out.reshape(n, h_out, w_out, cout)


def generator_forward_ref(params, x_nchw):
    x = jnp.transpose(x_nchw, (0, 2, 3, 1)).astype(jnp.float32)
    n_layers = len(params)
    for li, layer in enumerate(params):
        x = _ref_conv_transpose2d(x, layer["w"], layer["b"],
                                  _STRIDES[li], _PADDINGS[li])
        x = jnp.tanh(x) if li == n_layers - 1 else jnp.maximum(x, 0.0)
    return jnp.transpose(x, (0, 3, 1, 2))


if __name__ == "__main__":
    key = jax.random.PRNGKey(0)

    # Small DCGAN-generator config: latent 8, img channels 3, features_g 4.
    batch, channels_noise, channels_img, features_g = 2, 8, 3, 4

    pkey, xkey = jax.random.split(key)
    params = init_generator_params(pkey, channels_noise, channels_img, features_g)

    # Latent input, PyTorch-style NCHW: [N, z, 1, 1]
    x = jax.random.normal(xkey, (batch, channels_noise, 1, 1), dtype=jnp.float32)

    fwd = jax.jit(generator_forward)
    out = jax.block_until_ready(fwd(params, x))

    assert out.shape == (batch, channels_img, 64, 64), out.shape
    assert bool(jnp.all(jnp.isfinite(out)))
    assert bool(jnp.all(jnp.abs(out) <= 1.0 + 1e-5))  # tanh range

    # Numerical check against an independent pure-JAX f32 reference
    # (bf16 matmul inputs -> allow a few % relative error).
    ref = jax.block_until_ready(generator_forward_ref(params, x))
    err = float(jnp.max(jnp.abs(out - ref)))
    scale = float(jnp.max(jnp.abs(ref))) + 1e-12
    assert err <= 0.05 * scale + 1e-6, (err, scale)

    print("KERNEL_OK")
</pallas_src>

<mosaic_0001>
module attributes {stable_mosaic.version = 11 : i64} {
  func.func @_matmul_bias_act_kernel(%arg0: i32, %arg1: memref<2x8xbf16, #tpu.memory_space<vmem>>, %arg2: memref<8x512xbf16, #tpu.memory_space<vmem>>, %arg3: memref<1x512xf32, #tpu.memory_space<vmem>>, %arg4: memref<2x512xf32, #tpu.memory_space<vmem>>) attributes {dimension_semantics = [#tpu.dimension_semantics<parallel>], iteration_bounds = array<i64: 1>, scalar_prefetch = 0 : i64, scratch_operands = 0 : i64, tpu.core_type = #tpu.core_type<tc>, window_params = [{transform_indices = @transform_0, window_bounds = array<i64: 2, 8>}, {pipeline_mode = #tpu.pipeline_mode<synchronous>, transform_indices = @transform_1, window_bounds = array<i64: 8, 512>}, {pipeline_mode = #tpu.pipeline_mode<synchronous>, transform_indices = @transform_2, window_bounds = array<i64: 1, 512>}, {transform_indices = @transform_3, window_bounds = array<i64: 2, 512>}]} {
    %c0 = arith.constant 0 : index
    %c0_0 = arith.constant 0 : index
    %0 = vector.load %arg1[%c0, %c0_0] : memref<2x8xbf16, #tpu.memory_space<vmem>>, vector<2x8xbf16>
    %c0_1 = arith.constant 0 : index
    %c0_2 = arith.constant 0 : index
    %1 = vector.load %arg2[%c0_1, %c0_2] : memref<8x512xbf16, #tpu.memory_space<vmem>>, vector<8x512xbf16>
    %cst = arith.constant dense<0.000000e+00> : vector<2x512xf32>
    %2 = tpu.matmul %0, %1, %cst {dimension_numbers = #tpu.dot_dimension_numbers<[1], [0], [0], [1], [0, 0, 1, 1], [], []>} : vector<2x8xbf16>, vector<8x512xbf16>, vector<2x512xf32> -> vector<2x512xf32>
    %c0_3 = arith.constant 0 : index
    %c0_4 = arith.constant 0 : index
    %3 = vector.load %arg3[%c0_3, %c0_4] : memref<1x512xf32, #tpu.memory_space<vmem>>, vector<1x512xf32>
    %4 = vector.broadcast %3 : vector<1x512xf32> to vector<2x512xf32>
    %5 = arith.addf %2, %4 : vector<2x512xf32>
    %cst_5 = arith.constant 0.000000e+00 : f32
    %6 = vector.broadcast %cst_5 : f32 to vector<2x512xf32>
    %7 = arith.maximumf %5, %6 : vector<2x512xf32>
    %c0_6 = arith.constant 0 : index
    %c0_7 = arith.constant 0 : index
    %8 = vector.load %arg4[%c0_6, %c0_7] : memref<2x512xf32, #tpu.memory_space<vmem>>, vector<2x512xf32>
    tpu.vector_store %arg4[%c0_6, %c0_7], %7 {strides = array<i32>} : memref<2x512xf32, #tpu.memory_space<vmem>>, vector<2x512xf32>,
    return
  }
  func.func @transform_0(%arg0: i32) -> (i32, i32) {
    %c0_i32 = arith.constant 0 : i32
    %c0_i32_0 = arith.constant 0 : i32
    return %arg0, %c0_i32 : i32, i32
  }
  func.func @transform_1(%arg0: i32) -> (i32, i32) {
    %c0_i32 = arith.constant 0 : i32
    %c0_i32_0 = arith.constant 0 : i32
    %c0_i32_1 = arith.constant 0 : i32
    return %c0_i32, %c0_i32_0 : i32, i32
  }
  func.func @transform_2(%arg0: i32) -> (i32, i32) {
    %c0_i32 = arith.constant 0 : i32
    %c0_i32_0 = arith.constant 0 : i32
    %c0_i32_1 = arith.constant 0 : i32
    return %c0_i32, %c0_i32_0 : i32, i32
  }
  func.func @transform_3(%arg0: i32) -> (i32, i32) {
    %c0_i32 = arith.constant 0 : i32
    %c0_i32_0 = arith.constant 0 : i32
    return %arg0, %c0_i32 : i32, i32
  }
}

module attributes {stable_mosaic.version = 11 : i64} {
  func.func @_matmul_bias_act_kernel(%arg0: i32, %arg1: memref<16x32xbf16, #tpu.memory_space<vmem>>, %arg2: memref<32x256xbf16, #tpu.memory_space<vmem>>, %arg3: memref<1x256xf32, #tpu.memory_space<vmem>>, %arg4: memref<16x256xf32, #tpu.memory_space<vmem>>) attributes {dimension_semantics = [#tpu.dimension_semantics<parallel>], iteration_bounds = array<i64: 2>, scalar_prefetch = 0 : i64, scratch_operands = 0 : i64, tpu.core_type = #tpu.core_type<tc>, window_params = [{transform_indices = @transform_0, window_bounds = array<i64: 16, 32>}, {pipeline_mode = #tpu.pipeline_mode<synchronous>, transform_indices = @transform_1, window_bounds = array<i64: 32, 256>}, {pipeline_mode = #tpu.pipeline_mode<synchronous>, transform_indices = @transform_2, window_bounds = array<i64: 1, 256>}, {transform_indices = @transform_3, window_bounds = array<i64: 16, 256>}]} {
    %c0 = arith.constant 0 : index
    %c0_0 = arith.constant 0 : index
    %0 = vector.load %arg1[%c0, %c0_0] : memref<16x32xbf16, #tpu.memory_space<vmem>>, vector<16x32xbf16>
    %c0_1 = arith.constant 0 : index
    %c0_2 = arith.constant 0 : index
    %1 = vector.load %arg2[%c0_1, %c0_2] : memref<32x256xbf16, #tpu.memory_space<vmem>>, vector<32x256xbf16>
    %cst = arith.constant dense<0.000000e+00> : vector<16x256xf32>
    %2 = tpu.matmul %0, %1, %cst {dimension_numbers = #tpu.dot_dimension_numbers<[1], [0], [0], [1], [0, 0, 1, 1], [], []>} : vector<16x32xbf16>, vector<32x256xbf16>, vector<16x256xf32> -> vector<16x256xf32>
    %c0_3 = arith.constant 0 : index
    %c0_4 = arith.constant 0 : index
    %3 = vector.load %arg3[%c0_3, %c0_4] : memref<1x256xf32, #tpu.memory_space<vmem>>, vector<1x256xf32>
    %4 = vector.broadcast %3 : vector<1x256xf32> to vector<16x256xf32>
    %5 = arith.addf %2, %4 : vector<16x256xf32>
    %c0_5 = arith.constant 0 : index
    %c0_6 = arith.constant 0 : index
    %6 = vector.load %arg4[%c0_5, %c0_6] : memref<16x256xf32, #tpu.memory_space<vmem>>, vector<16x256xf32>
    tpu.vector_store %arg4[%c0_5, %c0_6], %5 {strides = array<i32>} : memref<16x256xf32, #tpu.memory_space<vmem>>, vector<16x256xf32>,
    return
  }
  func.func @transform_0(%arg0: i32) -> (i32, i32) {
    %c0_i32 = arith.constant 0 : i32
    %c0_i32_0 = arith.constant 0 : i32
    return %arg0, %c0_i32 : i32, i32
  }
  func.func @transform_1(%arg0: i32) -> (i32, i32) {
    %c0_i32 = arith.constant 0 : i32
    %c0_i32_0 = arith.constant 0 : i32
    %c0_i32_1 = arith.constant 0 : i32
    return %c0_i32, %c0_i32_0 : i32, i32
  }
  func.func @transform_2(%arg0: i32) -> (i32, i32) {
    %c0_i32 = arith.constant 0 : i32
    %c0_i32_0 = arith.constant 0 : i32
    %c0_i32_1 = arith.constant 0 : i32
    return %c0_i32, %c0_i32_0 : i32, i32
  }
  func.func @transform_3(%arg0: i32) -> (i32, i32) {
    %c0_i32 = arith.constant 0 : i32
    %c0_i32_0 = arith.constant 0 : i32
    return %arg0, %c0_i32 : i32, i32
  }
}

module attributes {stable_mosaic.version = 11 : i64} {
  func.func @_bias_act_kernel(%arg0: i32, %arg1: memref<8x128xf32, #tpu.memory_space<vmem>>, %arg2: memref<1x128xf32, #tpu.memory_space<vmem>>, %arg3: memref<8x128xf32, #tpu.memory_space<vmem>>) attributes {dimension_semantics = [#tpu.dimension_semantics<parallel>], iteration_bounds = array<i64: 2>, scalar_prefetch = 0 : i64, scratch_operands = 0 : i64, tpu.core_type = #tpu.core_type<tc>, window_params = [{transform_indices = @transform_0, window_bounds = array<i64: 8, 128>}, {pipeline_mode = #tpu.pipeline_mode<synchronous>, transform_indices = @transform_1, window_bounds = array<i64: 1, 128>}, {transform_indices = @transform_2, window_bounds = array<i64: 8, 128>}]} {
    %c0 = arith.constant 0 : index
    %c0_0 = arith.constant 0 : index
    %0 = vector.load %arg1[%c0, %c0_0] : memref<8x128xf32, #tpu.memory_space<vmem>>, vector<8x128xf32>
    %c0_1 = arith.constant 0 : index
    %c0_2 = arith.constant 0 : index
    %1 = vector.load %arg2[%c0_1, %c0_2] : memref<1x128xf32, #tpu.memory_space<vmem>>, vector<1x128xf32>
    %2 = vector.broadcast %1 : vector<1x128xf32> to vector<8x128xf32>
    %3 = arith.addf %0, %2 : vector<8x128xf32>
    %cst = arith.constant 0.000000e+00 : f32
    %4 = vector.broadcast %cst : f32 to vector<8x128xf32>
    %5 = arith.maximumf %3, %4 : vector<8x128xf32>
    %c0_3 = arith.constant 0 : index
    %c0_4 = arith.constant 0 : index
    %6 = vector.load %arg3[%c0_3, %c0_4] : memref<8x128xf32, #tpu.memory_space<vmem>>, vector<8x128xf32>
    tpu.vector_store %arg3[%c0_3, %c0_4], %5 {strides = array<i32>} : memref<8x128xf32, #tpu.memory_space<vmem>>, vector<8x128xf32>,
    return
  }
  func.func @transform_0(%arg0: i32) -> (i32, i32) {
    %c0_i32 = arith.constant 0 : i32
    %c0_i32_0 = arith.constant 0 : i32
    return %arg0, %c0_i32 : i32, i32
  }
  func.func @transform_1(%arg0: i32) -> (i32, i32) {
    %c0_i32 = arith.constant 0 : i32
    %c0_i32_0 = arith.constant 0 : i32
    %c0_i32_1 = arith.constant 0 : i32
    return %c0_i32, %c0_i32_0 : i32, i32
  }
  func.func @transform_2(%arg0: i32) -> (i32, i32) {
    %c0_i32 = arith.constant 0 : i32
    %c0_i32_0 = arith.constant 0 : i32
    return %arg0, %c0_i32 : i32, i32
  }
}

module attributes {stable_mosaic.version = 11 : i64} {
  func.func @_matmul_bias_act_kernel(%arg0: i32, %arg1: memref<64x16xbf16, #tpu.memory_space<vmem>>, %arg2: memref<16x128xbf16, #tpu.memory_space<vmem>>, %arg3: memref<1x128xf32, #tpu.memory_space<vmem>>, %arg4: memref<64x128xf32, #tpu.memory_space<vmem>>) attributes {dimension_semantics = [#tpu.dimension_semantics<parallel>], iteration_bounds = array<i64: 2>, scalar_prefetch = 0 : i64, scratch_operands = 0 : i64, tpu.core_type = #tpu.core_type<tc>, window_params = [{transform_indices = @transform_0, window_bounds = array<i64: 64, 16>}, {pipeline_mode = #tpu.pipeline_mode<synchronous>, transform_indices = @transform_1, window_bounds = array<i64: 16, 128>}, {pipeline_mode = #tpu.pipeline_mode<synchronous>, transform_indices = @transform_2, window_bounds = array<i64: 1, 128>}, {transform_indices = @transform_3, window_bounds = array<i64: 64, 128>}]} {
    %c0 = arith.constant 0 : index
    %c0_0 = arith.constant 0 : index
    %0 = vector.load %arg1[%c0, %c0_0] : memref<64x16xbf16, #tpu.memory_space<vmem>>, vector<64x16xbf16>
    %c0_1 = arith.constant 0 : index
    %c0_2 = arith.constant 0 : index
    %1 = vector.load %arg2[%c0_1, %c0_2] : memref<16x128xbf16, #tpu.memory_space<vmem>>, vector<16x128xbf16>
    %cst = arith.constant dense<0.000000e+00> : vector<64x128xf32>
    %2 = tpu.matmul %0, %1, %cst {dimension_numbers = #tpu.dot_dimension_numbers<[1], [0], [0], [1], [0, 0, 1, 1], [], []>} : vector<64x16xbf16>, vector<16x128xbf16>, vector<64x128xf32> -> vector<64x128xf32>
    %c0_3 = arith.constant 0 : index
    %c0_4 = arith.constant 0 : index
    %3 = vector.load %arg3[%c0_3, %c0_4] : memref<1x128xf32, #tpu.memory_space<vmem>>, vector<1x128xf32>
    %4 = vector.broadcast %3 : vector<1x128xf32> to vector<64x128xf32>
    %5 = arith.addf %2, %4 : vector<64x128xf32>
    %c0_5 = arith.constant 0 : index
    %c0_6 = arith.constant 0 : index
    %6 = vector.load %arg4[%c0_5, %c0_6] : memref<64x128xf32, #tpu.memory_space<vmem>>, vector<64x128xf32>
    tpu.vector_store %arg4[%c0_5, %c0_6], %5 {strides = array<i32>} : memref<64x128xf32, #tpu.memory_space<vmem>>, vector<64x128xf32>,
    return
  }
  func.func @transform_0(%arg0: i32) -> (i32, i32) {
    %c0_i32 = arith.constant 0 : i32
    %c0_i32_0 = arith.constant 0 : i32
    return %arg0, %c0_i32 : i32, i32
  }
  func.func @transform_1(%arg0: i32) -> (i32, i32) {
    %c0_i32 = arith.constant 0 : i32
    %c0_i32_0 = arith.constant 0 : i32
    %c0_i32_1 = arith.constant 0 : i32
    return %c0_i32, %c0_i32_0 : i32, i32
  }
  func.func @transform_2(%arg0: i32) -> (i32, i32) {
    %c0_i32 = arith.constant 0 : i32
    %c0_i32_0 = arith.constant 0 : i32
    %c0_i32_1 = arith.constant 0 : i32
    return %c0_i32, %c0_i32_0 : i32, i32
  }
  func.func @transform_3(%arg0: i32) -> (i32, i32) {
    %c0_i32 = arith.constant 0 : i32
    %c0_i32_0 = arith.constant 0 : i32
    return %arg0, %c0_i32 : i32, i32
  }
}

module attributes {stable_mosaic.version = 11 : i64} {
  func.func @_bias_act_kernel(%arg0: i32, %arg1: memref<16x128xf32, #tpu.memory_space<vmem>>, %arg2: memref<1x128xf32, #tpu.memory_space<vmem>>, %arg3: memref<16x128xf32, #tpu.memory_space<vmem>>) attributes {dimension_semantics = [#tpu.dimension_semantics<parallel>], iteration_bounds = array<i64: 2>, scalar_prefetch = 0 : i64, scratch_operands = 0 : i64, tpu.core_type = #tpu.core_type<tc>, window_params = [{transform_indices = @transform_0, window_bounds = array<i64: 16, 128>}, {pipeline_mode = #tpu.pipeline_mode<synchronous>, transform_indices = @transform_1, window_bounds = array<i64: 1, 128>}, {transform_indices = @transform_2, window_bounds = array<i64: 16, 128>}]} {
    %c0 = arith.constant 0 : index
    %c0_0 = arith.constant 0 : index
    %0 = vector.load %arg1[%c0, %c0_0] : memref<16x128xf32, #tpu.memory_space<vmem>>, vector<16x128xf32>
    %c0_1 = arith.constant 0 : index
    %c0_2 = arith.constant 0 : index
    %1 = vector.load %arg2[%c0_1, %c0_2] : memref<1x128xf32, #tpu.memory_space<vmem>>, vector<1x128xf32>
    %2 = vector.broadcast %1 : vector<1x128xf32> to vector<16x128xf32>
    %3 = arith.addf %0, %2 : vector<16x128xf32>
    %cst = arith.constant 0.000000e+00 : f32
    %4 = vector.broadcast %cst : f32 to vector<16x128xf32>
    %5 = arith.maximumf %3, %4 : vector<16x128xf32>
    %c0_3 = arith.constant 0 : index
    %c0_4 = arith.constant 0 : index
    %6 = vector.load %arg3[%c0_3, %c0_4] : memref<16x128xf32, #tpu.memory_space<vmem>>, vector<16x128xf32>
    tpu.vector_store %arg3[%c0_3, %c0_4], %5 {strides = array<i32>} : memref<16x128xf32, #tpu.memory_space<vmem>>, vector<16x128xf32>,
    return
  }
  func.func @transform_0(%arg0: i32) -> (i32, i32) {
    %c0_i32 = arith.constant 0 : i32
    %c0_i32_0 = arith.constant 0 : i32
    return %arg0, %c0_i32 : i32, i32
  }
  func.func @transform_1(%arg0: i32) -> (i32, i32) {
    %c0_i32 = arith.constant 0 : i32
    %c0_i32_0 = arith.constant 0 : i32
    %c0_i32_1 = arith.constant 0 : i32
    return %c0_i32, %c0_i32_0 : i32, i32
  }
  func.func @transform_2(%arg0: i32) -> (i32, i32) {
    %c0_i32 = arith.constant 0 : i32
    %c0_i32_0 = arith.constant 0 : i32
    return %arg0, %c0_i32 : i32, i32
  }
}

module attributes {stable_mosaic.version = 11 : i64} {
  func.func @_matmul_bias_act_kernel(%arg0: i32, %arg1: memref<256x8xbf16, #tpu.memory_space<vmem>>, %arg2: memref<8x64xbf16, #tpu.memory_space<vmem>>, %arg3: memref<1x64xf32, #tpu.memory_space<vmem>>, %arg4: memref<256x64xf32, #tpu.memory_space<vmem>>) attributes {dimension_semantics = [#tpu.dimension_semantics<parallel>], iteration_bounds = array<i64: 2>, scalar_prefetch = 0 : i64, scratch_operands = 0 : i64, tpu.core_type = #tpu.core_type<tc>, window_params = [{transform_indices = @transform_0, window_bounds = array<i64: 256, 8>}, {pipeline_mode = #tpu.pipeline_mode<synchronous>, transform_indices = @transform_1, window_bounds = array<i64: 8, 64>}, {pipeline_mode = #tpu.pipeline_mode<synchronous>, transform_indices = @transform_2, window_bounds = array<i64: 1, 64>}, {transform_indices = @transform_3, window_bounds = array<i64: 256, 64>}]} {
    %c0 = arith.constant 0 : index
    %c0_0 = arith.constant 0 : index
    %0 = vector.load %arg1[%c0, %c0_0] : memref<256x8xbf16, #tpu.memory_space<vmem>>, vector<256x8xbf16>
    %c0_1 = arith.constant 0 : index
    %c0_2 = arith.constant 0 : index
    %1 = vector.load %arg2[%c0_1, %c0_2] : memref<8x64xbf16, #tpu.memory_space<vmem>>, vector<8x64xbf16>
    %cst = arith.constant dense<0.000000e+00> : vector<256x64xf32>
    %2 = tpu.matmul %0, %1, %cst {dimension_numbers = #tpu.dot_dimension_numbers<[1], [0], [0], [1], [0, 0, 1, 1], [], []>} : vector<256x8xbf16>, vector<8x64xbf16>, vector<256x64xf32> -> vector<256x64xf32>
    %c0_3 = arith.constant 0 : index
    %c0_4 = arith.constant 0 : index
    %3 = vector.load %arg3[%c0_3, %c0_4] : memref<1x64xf32, #tpu.memory_space<vmem>>, vector<1x64xf32>
    %4 = vector.broadcast %3 : vector<1x64xf32> to vector<256x64xf32>
    %5 = arith.addf %2, %4 : vector<256x64xf32>
    %c0_5 = arith.constant 0 : index
    %c0_6 = arith.constant 0 : index
    %6 = vector.load %arg4[%c0_5, %c0_6] : memref<256x64xf32, #tpu.memory_space<vmem>>, vector<256x64xf32>
    tpu.vector_store %arg4[%c0_5, %c0_6], %5 {strides = array<i32>} : memref<256x64xf32, #tpu.memory_space<vmem>>, vector<256x64xf32>,
    return
  }
  func.func @transform_0(%arg0: i32) -> (i32, i32) {
    %c0_i32 = arith.constant 0 : i32
    %c0_i32_0 = arith.constant 0 : i32
    return %arg0, %c0_i32 : i32, i32
  }
  func.func @transform_1(%arg0: i32) -> (i32, i32) {
    %c0_i32 = arith.constant 0 : i32
    %c0_i32_0 = arith.constant 0 : i32
    %c0_i32_1 = arith.constant 0 : i32
    return %c0_i32, %c0_i32_0 : i32, i32
  }
  func.func @transform_2(%arg0: i32) -> (i32, i32) {
    %c0_i32 = arith.constant 0 : i32
    %c0_i32_0 = arith.constant 0 : i32
    %c0_i32_1 = arith.constant 0 : i32
    return %c0_i32, %c0_i32_0 : i32, i32
  }
  func.func @transform_3(%arg0: i32) -> (i32, i32) {
    %c0_i32 = arith.constant 0 : i32
    %c0_i32_0 = arith.constant 0 : i32
    return %arg0, %c0_i32 : i32, i32
  }
}

module attributes {stable_mosaic.version = 11 : i64} {
  func.func @_bias_act_kernel(%arg0: i32, %arg1: memref<32x128xf32, #tpu.memory_space<vmem>>, %arg2: memref<1x128xf32, #tpu.memory_space<vmem>>, %arg3: memref<32x128xf32, #tpu.memory_space<vmem>>) attributes {dimension_semantics = [#tpu.dimension_semantics<parallel>], iteration_bounds = array<i64: 2>, scalar_prefetch = 0 : i64, scratch_operands = 0 : i64, tpu.core_type = #tpu.core_type<tc>, window_params = [{transform_indices = @transform_0, window_bounds = array<i64: 32, 128>}, {pipeline_mode = #tpu.pipeline_mode<synchronous>, transform_indices = @transform_1, window_bounds = array<i64: 1, 128>}, {transform_indices = @transform_2, window_bounds = array<i64: 32, 128>}]} {
    %c0 = arith.constant 0 : index
    %c0_0 = arith.constant 0 : index
    %0 = vector.load %arg1[%c0, %c0_0] : memref<32x128xf32, #tpu.memory_space<vmem>>, vector<32x128xf32>
    %c0_1 = arith.constant 0 : index
    %c0_2 = arith.constant 0 : index
    %1 = vector.load %arg2[%c0_1, %c0_2] : memref<1x128xf32, #tpu.memory_space<vmem>>, vector<1x128xf32>
    %2 = vector.broadcast %1 : vector<1x128xf32> to vector<32x128xf32>
    %3 = arith.addf %0, %2 : vector<32x128xf32>
    %cst = arith.constant 0.000000e+00 : f32
    %4 = vector.broadcast %cst : f32 to vector<32x128xf32>
    %5 = arith.maximumf %3, %4 : vector<32x128xf32>
    %c0_3 = arith.constant 0 : index
    %c0_4 = arith.constant 0 : index
    %6 = vector.load %arg3[%c0_3, %c0_4] : memref<32x128xf32, #tpu.memory_space<vmem>>, vector<32x128xf32>
    tpu.vector_store %arg3[%c0_3, %c0_4], %5 {strides = array<i32>} : memref<32x128xf32, #tpu.memory_space<vmem>>, vector<32x128xf32>,
    return
  }
  func.func @transform_0(%arg0: i32) -> (i32, i32) {
    %c0_i32 = arith.constant 0 : i32
    %c0_i32_0 = arith.constant 0 : i32
    return %arg0, %c0_i32 : i32, i32
  }
  func.func @transform_1(%arg0: i32) -> (i32, i32) {
    %c0_i32 = arith.constant 0 : i32
    %c0_i32_0 = arith.constant 0 : i32
    %c0_i32_1 = arith.constant 0 : i32
    return %c0_i32, %c0_i32_0 : i32, i32
  }
  func.func @transform_2(%arg0: i32) -> (i32, i32) {
    %c0_i32 = arith.constant 0 : i32
    %c0_i32_0 = arith.constant 0 : i32
    return %arg0, %c0_i32 : i32, i32
  }
}

module attributes {stable_mosaic.version = 11 : i64} {
  func.func @_matmul_bias_act_kernel(%arg0: i32, %arg1: memref<512x4xbf16, #tpu.memory_space<vmem>>, %arg2: memref<4x48xbf16, #tpu.memory_space<vmem>>, %arg3: memref<1x48xf32, #tpu.memory_space<vmem>>, %arg4: memref<512x48xf32, #tpu.memory_space<vmem>>) attributes {dimension_semantics = [#tpu.dimension_semantics<parallel>], iteration_bounds = array<i64: 4>, scalar_prefetch = 0 : i64, scratch_operands = 0 : i64, tpu.core_type = #tpu.core_type<tc>, window_params = [{transform_indices = @transform_0, window_bounds = array<i64: 512, 4>}, {pipeline_mode = #tpu.pipeline_mode<synchronous>, transform_indices = @transform_1, window_bounds = array<i64: 4, 48>}, {pipeline_mode = #tpu.pipeline_mode<synchronous>, transform_indices = @transform_2, window_bounds = array<i64: 1, 48>}, {transform_indices = @transform_3, window_bounds = array<i64: 512, 48>}]} {
    %c0 = arith.constant 0 : index
    %c0_0 = arith.constant 0 : index
    %0 = vector.load %arg1[%c0, %c0_0] : memref<512x4xbf16, #tpu.memory_space<vmem>>, vector<512x4xbf16>
    %c0_1 = arith.constant 0 : index
    %c0_2 = arith.constant 0 : index
    %1 = vector.load %arg2[%c0_1, %c0_2] : memref<4x48xbf16, #tpu.memory_space<vmem>>, vector<4x48xbf16>
    %cst = arith.constant dense<0.000000e+00> : vector<512x48xf32>
    %2 = tpu.matmul %0, %1, %cst {dimension_numbers = #tpu.dot_dimension_numbers<[1], [0], [0], [1], [0, 0, 1, 1], [], []>} : vector<512x4xbf16>, vector<4x48xbf16>, vector<512x48xf32> -> vector<512x48xf32>
    %c0_3 = arith.constant 0 : index
    %c0_4 = arith.constant 0 : index
    %3 = vector.load %arg3[%c0_3, %c0_4] : memref<1x48xf32, #tpu.memory_space<vmem>>, vector<1x48xf32>
    %4 = vector.broadcast %3 : vector<1x48xf32> to vector<512x48xf32>
    %5 = arith.addf %2, %4 : vector<512x48xf32>
    %c0_5 = arith.constant 0 : index
    %c0_6 = arith.constant 0 : index
    %6 = vector.load %arg4[%c0_5, %c0_6] : memref<512x48xf32, #tpu.memory_space<vmem>>, vector<512x48xf32>
    tpu.vector_store %arg4[%c0_5, %c0_6], %5 {strides = array<i32>} : memref<512x48xf32, #tpu.memory_space<vmem>>, vector<512x48xf32>,
    return
  }
  func.func @transform_0(%arg0: i32) -> (i32, i32) {
    %c0_i32 = arith.constant 0 : i32
    %c0_i32_0 = arith.constant 0 : i32
    return %arg0, %c0_i32 : i32, i32
  }
  func.func @transform_1(%arg0: i32) -> (i32, i32) {
    %c0_i32 = arith.constant 0 : i32
    %c0_i32_0 = arith.constant 0 : i32
    %c0_i32_1 = arith.constant 0 : i32
    return %c0_i32, %c0_i32_0 : i32, i32
  }
  func.func @transform_2(%arg0: i32) -> (i32, i32) {
    %c0_i32 = arith.constant 0 : i32
    %c0_i32_0 = arith.constant 0 : i32
    %c0_i32_1 = arith.constant 0 : i32
    return %c0_i32, %c0_i32_0 : i32, i32
  }
  func.func @transform_3(%arg0: i32) -> (i32, i32) {
    %c0_i32 = arith.constant 0 : i32
    %c0_i32_0 = arith.constant 0 : i32
    return %arg0, %c0_i32 : i32, i32
  }
}

module attributes {stable_mosaic.version = 11 : i64} {
  func.func @_bias_act_kernel(%arg0: i32, %arg1: memref<64x192xf32, #tpu.memory_space<vmem>>, %arg2: memref<1x192xf32, #tpu.memory_space<vmem>>, %arg3: memref<64x192xf32, #tpu.memory_space<vmem>>) attributes {dimension_semantics = [#tpu.dimension_semantics<parallel>], iteration_bounds = array<i64: 2>, scalar_prefetch = 0 : i64, scratch_operands = 0 : i64, tpu.core_type = #tpu.core_type<tc>, window_params = [{transform_indices = @transform_0, window_bounds = array<i64: 64, 192>}, {pipeline_mode = #tpu.pipeline_mode<synchronous>, transform_indices = @transform_1, window_bounds = array<i64: 1, 192>}, {transform_indices = @transform_2, window_bounds = array<i64: 64, 192>}]} {
    %c0 = arith.constant 0 : index
    %c0_0 = arith.constant 0 : index
    %0 = vector.load %arg1[%c0, %c0_0] : memref<64x192xf32, #tpu.memory_space<vmem>>, vector<64x192xf32>
    %c0_1 = arith.constant 0 : index
    %c0_2 = arith.constant 0 : index
    %1 = vector.load %arg2[%c0_1, %c0_2] : memref<1x192xf32, #tpu.memory_space<vmem>>, vector<1x192xf32>
    %2 = vector.broadcast %1 : vector<1x192xf32> to vector<64x192xf32>
    %3 = arith.addf %0, %2 : vector<64x192xf32>
    %4 = math.tanh %3 : vector<64x192xf32>
    %c0_3 = arith.constant 0 : index
    %c0_4 = arith.constant 0 : index
    %5 = vector.load %arg3[%c0_3, %c0_4] : memref<64x192xf32, #tpu.memory_space<vmem>>, vector<64x192xf32>
    tpu.vector_store %arg3[%c0_3, %c0_4], %4 {strides = array<i32>} : memref<64x192xf32, #tpu.memory_space<vmem>>, vector<64x192xf32>,
    return
  }
  func.func @transform_0(%arg0: i32) -> (i32, i32) {
    %c0_i32 = arith.constant 0 : i32
    %c0_i32_0 = arith.constant 0 : i32
    return %arg0, %c0_i32 : i32, i32
  }
  func.func @transform_1(%arg0: i32) -> (i32, i32) {
    %c0_i32 = arith.constant 0 : i32
    %c0_i32_0 = arith.constant 0 : i32
    %c0_i32_1 = arith.constant 0 : i32
    return %c0_i32, %c0_i32_0 : i32, i32
  }
  func.func @transform_2(%arg0: i32) -> (i32, i32) {
    %c0_i32 = arith.constant 0 : i32
    %c0_i32_0 = arith.constant 0 : i32
    return %arg0, %c0_i32 : i32, i32
  }
}

</mosaic_0001>

<bundles_post_ra>
// kernel: tile.28
= control target key start
LH: loop header
LB: loop body
LE: loop exit
PB: predicated region body
PF: predicated region fallthrough
CT: control target
= control target key end

     0   :  { %2 = vsyncpa [#allocation1], 0  ;;  %s47_s6 = smov [#allocation0]   ;;  %s76_s0 = inlined_call_operand.hbm [shape: f32[32], index: 0, kind: input, shape index: {}]   ;;  %s77_s1 = inlined_call_operand.vmem [shape: f32[16,32], index: 1, kind: output, shape index: {}]  }
   0x1   :  { %s9_s7 = sshll.u32 %s47_s6, 4  ;;  %s23_s10 = scalar_lea.hbm %s76_s0, 16  ;;  %s10_s7 = int_to_ptr.vmem [resolvable:$true] %s9_s7 }
   0x2   :  { %p24_p0 = scmp.ne.s32.totalorder %s76_s0, %s23_s10  ;;  %p27_p1 = scmp.lt.u32.totalorder %s23_s10, %s76_s0 }
   0x4   :  { %p29_p2 = pnand %p27_p1, %p24_p0 }
   0x6   :  { %32 = shalt.err (!%p29_p2)
}
   0x7   :  { %s33_s15 = scalar_lea.vmem %s10_s7, 16  ;;  %s37_s16 = scalar_lea.vmem %s10_s7, 32 }
   0x8   :  { %p34_p3 = scmp.ne.s32.totalorder %s10_s7, %s33_s15  ;;  %p38_p4 = scmp.lt.s32.totalorder %s10_s7, %s10_s7 }
   0x9   :  { %p39_p5 = scmp.lt.s32.totalorder %s37_s16, %s33_s15 }
   0xb   :  { %p40_p6 = por %p39_p5, %p38_p4 }
   0xd   :  { %p41_p7 = pnand %p40_p6, %p34_p3 }
   0xf   :  { %44 = shalt.err (!%p41_p7)
}
  0x10   :  { %12 = dma.hbm_to_vmem [thread:$0]  %s76_s0, 16, %s10_s7, [#allocation1]  }
  0x11   :  { %45 = dma.done.wait [#allocation1], 16  }
  0x12   :  { %46 = vsyncadd [#allocation1], 4294967280  ;;  %v16_v0 = vld [vmem:[#allocation0] ss:$0 sm:$0xff] }
  0x13   :  { %17 = vst [vmem:[%s77_s1] sm:$0xff] %v16_v0  ;;  %21 = vst [vmem:[%s77_s1 + $0x8] sm:$0xff] %v16_v0 }
  0x14   :  { %20 = vsyncpa [#allocation1], 1 }

// kernel: tile.29
= control target key start
LH: loop header
LB: loop body
LE: loop exit
PB: predicated region body
PF: predicated region fallthrough
CT: control target
= control target key end

     0   :  { %s57_s8 = smov 96   ;;  %vm3_vm0 = vcmask 261120   ;;  %s59_s15 = smov 64   ;;  %vm9_vm1 = vcmask 1048320   ;;  %vm15_vm2 = vcmask 785920   ;;  %vm21_vm3 = vcmask 523520   ;;  %s94_s0 = inlined_call_operand.vmem [shape: f32[16,32], index: 0, kind: input, shape index: {}]   ;;  %s95_s1 = inlined_call_operand.vmem [shape: f32[1,512], index: 1, kind: output, shape index: {}]  }
   0x1   :  { %v48_v0 = vld [vmem:[%s94_s0 + $0x3] ss:$4 sm:$0xf]   ;;  %v49_v1 = vld [vmem:[%s94_s0 + $0x2] ss:$4 sm:$0xf]  }
   0x2   :  { %7 = vrot.lane.b32.xlu0 %v48_v0, %s57_s8  ;;  %v50_v2 = vld [vmem:[%s94_s0 + $0x1] ss:$4 sm:$0xf]   ;;  %v2_v3 = vld [vmem:[%s94_s0] ss:$4 sm:$0xf]  }
   0x3   :  { %s58_s0 = smov 32   ;;  %4 = vst.msk [vmem:[#allocation0] ss:$8 sm:$0xf] %vm3_vm0, %v2_v3  }
   0x4   :  { %19 = vrot.lane.b32.xlu1 %v50_v2, %s58_s0 }
   0x6   :  { %13 = vrot.lane.b32.xlu0 %v49_v1, %s59_s15 }
  0x74   :  { %v8_v4 = vpop.permute.xlu0 %7  }
  0x75   :  { %10 = vst.msk [vmem:[#allocation0] ss:$8 sm:$0xf] %vm9_vm1, %v8_v4  }
  0x76   :  { %v20_v5 = vpop.permute.xlu1 %19  }
  0x78   :  { %v14_v6 = vpop.permute.xlu0 %13  }
  0x79   :  { %16 = vst.msk [vmem:[#allocation0] ss:$8 sm:$0xf] %vm15_vm2, %v14_v6  }
  0x7a   :  { %22 = vst.msk [vmem:[#allocation0] ss:$8 sm:$0xf] %vm21_vm3, %v20_v5  }
  0x81   :  { %v26_v7 = vld [vmem:[#allocation0] sm:$0x1]  ;;  %v30_v8 = vld [vmem:[#allocation0 + $0x8] sm:$0x1]  ;;  %v35_v9 = vld [vmem:[#allocation0 + $0x10] sm:$0x1] }
  0x82   :  { %28 = vst [vmem:[%s95_s1] sm:$0x1] %v26_v7  ;;  %51 = vst [vmem:[%s95_s1 + $0x1] sm:$0x1] %v30_v8  ;;  %v41_v10 = vld [vmem:[#allocation0 + $0x18] sm:$0x1] }
  0x83   :  { %52 = vst [vmem:[%s95_s1 + $0x2] sm:$0x1] %v35_v9  ;;  %53 = vst [vmem:[%s95_s1 + $0x3] sm:$0x1] %v41_v10 }

// kernel: generator_forward.10
= control target key start
LH: loop header
LB: loop body
LE: loop exit
PB: predicated region body
PF: predicated region fallthrough
CT: control target
= control target key end

     0   :  { %s393_s12 = smov 0   ;;  %s425_s0 = inlined_call_operand.vmem [shape: bf16[32,32], index: 0, kind: input, shape index: {}]   ;;  %s426_s1 = inlined_call_operand.vmem [shape: bf16[32,256], index: 1, kind: input, shape index: {}]   ;;  %s427_s2 = inlined_call_operand.vmem [shape: f32[1,256], index: 2, kind: input, shape index: {}]   ;;  %s428_s3 = inlined_call_operand.vmem [shape: f32[32,256], index: 3, kind: output, shape index: {}]  }
   0x1 LB: > { %s329_s13 = sadd.s32 4294967295, %s370_s12   ;;  %p333_p0 = scmp.ge.s32.totalorder %s370_s12, 1  ;;  %s370_s12 = sphi %s393_s12, %s13_s12  }
   0x2   : > { %p138_p1 = scmp.lt.s32.totalorder %s370_s12, 3 }
   0x4   : > { %p139_p2 = pnand %p333_p0, %p138_p1 }
   0x5   : > { %v357_v0 = vld [vmem:[%s426_s1 + $0x4] ss:$8 sps:$4 sm:$0xff] (!%p139_p2)   ;;  %s334_s16 = sshll.u32 (!%p139_p2), %s329_s13, 1  ;;  %v359_v1 = vld [vmem:[%s426_s1] ss:$8 sps:$4 sm:$0xff] (!%p139_p2)   ;;  %v372_v2 = vmov (!%p139_p2), 0   ;;  %v185_v6 = vlaneseq (!%p139_p2) }
   0x6   : > { %142 = sbr.rel (%p139_p2) target bundleno = 235 (0xeb), region = 32  ;;  %256 = vmatprep.mubr.bf16.mxu0 (!%p139_p2), %v372_v2  ;;  %p164_p3 = scmp.lt.s32.totalorder (!%p139_p2), %s334_s16, 3  ;;  %224 = vmatprep.subr.bf16.mxu0 (!%p139_p2), %v357_v0  ;;  %v360_v3 = vld [vmem:[%s426_s1 + $0x14] ss:$8 sps:$4 sm:$0xff] (!%p139_p2)   ;;  %v362_v4 = vld [vmem:[%s426_s1 + $0x10] ss:$8 sps:$4 sm:$0xff] (!%p139_p2)  }
   0x7   : > { %225 = vmatpush1.bf16.msra.mxu0 (!%p139_p2), %v359_v1  ;;  %vm220_vm0 = vcmask (!%p139_p2), 261120   ;;  %v186_v7 = vshrl.u32 (!%p139_p2), %v185_v6, 7  ;;  %v183_v9 = vld [vmem:[%s427_s2] sm:$0x3] (!%p139_p2) }
   0x8   : > { %226 = vmatprep.subr.bf16.mxu0 (!%p139_p2), %v360_v3 }
   0x9   : > { %v187_v8 = vsub.s32 (!%p139_p2), 0, %v186_v7  ;;  %v191_v10 = vsub.s32 (!%p139_p2), 1, %v186_v7 }
   0xb   : > { %227 = vmatpush1.bf16.msra.mxu0 (!%p139_p2), %v362_v4  ;;  %v188_v11 = vrot.slane (!%p139_p2), %v183_v9, %v187_v8  ;;  %v192_v12 = vrot.slane (!%p139_p2), %v183_v9, %v191_v10 }
   0xd   : > { %s430_s16 = smov (!%p164_p3, %s334_s16), 3 }
   0xe   : > { %s335_s23 = sshll.u32 %s430_s16, 2  ;;  %s347_s29 = sshll.u32 %s430_s16, 4 }
   0xf   : > { %s167_s26 = scalar_lea.vmem %s425_s0, %s335_s23  ;;  %s174_s5 = scalar_lea.vmem %s428_s3, %s347_s29 }
  0x10   : > { %v363_v5 = vld [vmem:[%s167_s26] sm:$0xff]  }
  0x11   : > { %344 = vmatmul.mubr.msk.bf16.vlgmr.msra.gmra.mrb[0].mxu0 %vm220_vm0, %v363_v5 }
  0xe4   : > { %v258_v13 = vpop.f32.mrb[0].mxu0 }
  0xe5   : > { %v259_v14 = vadd.f32 %v258_v13, %v188_v11  ;;  %v260_v15 = vpop.f32.mrb[1].mxu0 }
  0xe6   : > { %v261_v16 = vadd.f32 %v260_v15, %v192_v12  ;;  %v262_v17 = vpop.f32.mrb[2].mxu0 }
  0xe7   : > { %267 = vst [vmem:[%s174_s5] sm:$0xff] %v259_v14  ;;  %v263_v18 = vadd.f32 %v262_v17, %v188_v11  ;;  %v264_v19 = vpop.f32.mrb[3].mxu0 }
  0xe8   : > { %268 = vst [vmem:[%s174_s5 + $0x8] sm:$0xff] %v261_v16  ;;  %v265_v20 = vadd.f32 %v264_v19, %v192_v12 }
  0xe9   : > { %269 = vst [vmem:[%s174_s5 + $0x10] sm:$0xff] %v263_v18 }
  0xea   : > { %270 = vst [vmem:[%s174_s5 + $0x18] sm:$0xff] %v265_v20 }
  0xeb PF: > { %s13_s12 = sadd.s32 1, %s370_s12  }
  0xec   : > { %p10_p4 = scmp.ge.s32.totalorder %s13_s12, 4  }
  0xee   :  { %12 = sbr.rel (!%p10_p4) target bundleno = 1 (0x1), region = 62 }

// kernel: generator_forward.9
= control target key start
LH: loop header
LB: loop body
LE: loop exit
PB: predicated region body
PF: predicated region fallthrough
CT: control target
= control target key end

     0   :  { %vm54_vm0 = vcmask 1043456   ;;  %v194_v2 = vmov 0   ;;  %vm50_vm1 = vcmask 64512   ;;  %v20_v10 = vlaneseq  ;;  %s231_s1 = inlined_call_operand.vmem [shape: bf16[8,512], index: 1, kind: input, shape index: {}]   ;;  %s232_s0 = inlined_call_operand.vmem [shape: bf16[2,8], index: 0, kind: input, shape index: {}]   ;;  %s233_s2 = inlined_call_operand.vmem [shape: f32[1,512], index: 2, kind: input, shape index: {}]   ;;  %s234_s3 = inlined_call_operand.vmem [shape: f32[2,512], index: 3, kind: output, shape index: {}]  }
   0x1   :  { %v16_v0 = vld [vmem:[%s231_s1] sm:$0xff]  ;;  %v17_v1 = vld [vmem:[%s231_s1 + $0x8] sm:$0xff]  ;;  %99 = vmatprep.mubr.bf16.mxu0 %v194_v2  ;;  %140 = vmatprep.mubr.bf16.mxu1 %v194_v2  ;;  %v195_v17 = vmov 1983009808  }
   0x2   :  { %v181_v3 = vcombine.high %v16_v0, %v16_v0  ;;  %v183_v4 = vcombine.high %v17_v1, %v17_v1  ;;  %v180_v5 = vcombine.low %v16_v0, %v16_v0  ;;  %v182_v6 = vcombine.low %v17_v1, %v17_v1  ;;  %v15_v9 = vld [vmem:[%s232_s0] sm:$0x1] }
   0x3   :  { %v21_v11 = vshrl.u32 %v20_v10, 7  ;;  %v18_v14 = vld [vmem:[%s233_s2] sm:$0xf]  ;;  %v160_v18 = vunpack.c.l.s4 %v195_v17 }
   0x4   :  { %184 = vmatprep.subr.msk.bf16.mxu0 %vm54_vm0, %v181_v3  ;;  %186 = vmatprep.subr.msk.bf16.mxu1 %vm54_vm0, %v183_v4  ;;  %v56_v7 = vsel %vm54_vm0, %v180_v5, 0  ;;  %v62_v8 = vsel %vm54_vm0, %v182_v6, 0 }
   0x5   :  { %68 = vmatpush1.bf16.msra.mxu0 %v56_v7  ;;  %109 = vmatpush1.bf16.msra.mxu1 %v62_v8  ;;  %v22_v12 = vsub.s32 0, %v21_v11  ;;  %v30_v13 = vsub.s32 2, %v21_v11  ;;  %v26_v15 = vsub.s32 1, %v21_v11  ;;  %v34_v16 = vsub.s32 3, %v21_v11 }
   0x6   :  { %v161_v25 = vunpack.c.0.s8 %v160_v18 }
   0x7   :  { %v23_v19 = vrot.slane %v18_v14, %v22_v12  ;;  %v31_v20 = vrot.slane %v18_v14, %v30_v13  ;;  %v27_v21 = vrot.slane %v18_v14, %v26_v15  ;;  %v35_v22 = vrot.slane %v18_v14, %v34_v16 }
   0x8   :  { %185 = vmatmul.mubr.msk.bf16.vlgmr.msra.gmra.mrb[0].mxu0 %vm50_vm1, %v15_v9  ;;  %187 = vmatmul.mubr.msk.bf16.vlgmr.msra.gmra.mrb[0].mxu1 %vm50_vm1, %v15_v9  ;;  %v164_v39 = vsub.s32 %v161_v25, %v21_v11 }
  0xdb   :  { %v101_v23 = vpop.f32.mrb[0].mxu0  ;;  %v142_v24 = vpop.f32.mrb[0].mxu1 }
  0xdc   :  { %v102_v26 = vadd.f32 %v101_v23, %v23_v19  ;;  %v143_v27 = vadd.f32 %v142_v24, %v31_v20  ;;  %v103_v28 = vpop.f32.mrb[1].mxu0  ;;  %v144_v29 = vpop.f32.mrb[1].mxu1 }
  0xdd   :  { %v104_v30 = vadd.f32 %v103_v28, %v27_v21  ;;  %v145_v31 = vadd.f32 %v144_v29, %v35_v22  ;;  %v105_v32 = vpop.f32.mrb[2].mxu0  ;;  %v146_v33 = vpop.f32.mrb[2].mxu1 }
  0xde   :  { %v149_v34 = vmax.f32 %v102_v26, 0.0  ;;  %v151_v35 = vmax.f32 %v143_v27, 0.0  ;;  %v106_v36 = vpop.f32.mrb[3].mxu0  ;;  %v147_v37 = vpop.f32.mrb[3].mxu1 }
  0xdf   :  { %v150_v38 = vmax.f32 %v104_v30, 0.0  ;;  %v152_v40 = vmax.f32 %v145_v31, 0.0 }
  0xe1   :  { %v157_v41 = vcombine.low %v149_v34, %v150_v38  ;;  %v158_v42 = vcombine.low %v151_v35, %v152_v40 }
  0xe3   :  { %v165_v43 = vrot.slane %v157_v41, %v164_v39  ;;  %v172_v44 = vrot.slane %v158_v42, %v164_v39 }
  0xe5   :  { %v173_v45 = vcombine.low %v165_v43, %v172_v44 }
  0xe7   :  { %175 = vst [vmem:[%s234_s3] sm:$0xff] %v173_v45 }

// kernel: tile.33
= control target key start
LH: loop header
LB: loop body
LE: loop exit
PB: predicated region body
PF: predicated region fallthrough
CT: control target
= control target key end

     0   :  { %s22_s0 = inlined_call_operand.vmem [shape: f32[16], index: 0, kind: input, shape index: {}]   ;;  %s23_s1 = inlined_call_operand.vmem [shape: f32[8,16], index: 1, kind: output, shape index: {}]  }
   0x1   :  { %v4_v0 = vld [vmem:[%s22_s0] ss:$0 sm:$0xff] }
   0x2   :  { %5 = vst [vmem:[%s23_s1] sm:$0xff] %v4_v0 }

// kernel: tile.34
= control target key start
LH: loop header
LB: loop body
LE: loop exit
PB: predicated region body
PF: predicated region fallthrough
CT: control target
= control target key end

     0   :  { %s67_s10 = smov 112   ;;  %s68_s11 = smov 80   ;;  %vm3_vm0 = vcmask 130048   ;;  %vm9_vm1 = vcmask 1048448   ;;  %vm15_vm2 = vcmask 917248   ;;  %vm21_vm3 = vcmask 786048   ;;  %s111_s0 = inlined_call_operand.vmem [shape: f32[8,16], index: 0, kind: input, shape index: {}]   ;;  %s112_s1 = inlined_call_operand.vmem [shape: f32[1,128], index: 1, kind: output, shape index: {}]  }
   0x1   :  { %v53_v0 = vld [vmem:[%s111_s0 + $0x7] sm:$0x1]   ;;  %v55_v1 = vld [vmem:[%s111_s0 + $0x5] sm:$0x1]   ;;  %v54_v2 = vld [vmem:[%s111_s0 + $0x6] sm:$0x1]  }
   0x2   :  { %7 = vrot.lane.b32.xlu0 %v53_v0, %s67_s10  ;;  %19 = vrot.lane.b32.xlu1 %v55_v1, %s68_s11  ;;  %v56_v3 = vld [vmem:[%s111_s0 + $0x4] sm:$0x1]   ;;  %v2_v4 = vld [vmem:[%s111_s0] sm:$0x1]   ;;  %s69_s18 = smov 96   ;;  %s70_s19 = smov 64  }
   0x3   :  { %4 = vst.msk [vmem:[#allocation0] sm:$0x1] %vm3_vm0, %v2_v4   ;;  %v57_v5 = vld [vmem:[%s111_s0 + $0x3] sm:$0x1]   ;;  %v58_v6 = vld [vmem:[%s111_s0 + $0x2] sm:$0x1]  }
   0x4   :  { %s71_s24 = smov 48   ;;  %s72_s25 = smov 32   ;;  %v59_v7 = vld [vmem:[%s111_s0 + $0x1] sm:$0x1]   ;;  %vm27_vm4 = vcmask 654848   ;;  %vm33_vm5 = vcmask 523648  }
   0x5   :  { %s73_s0 = smov 16   ;;  %vm39_vm6 = vcmask 392448   ;;  %vm45_vm7 = vcmask 261248  }
   0x6   :  { %13 = vrot.lane.b32.xlu0 %v54_v2, %s69_s18  ;;  %25 = vrot.lane.b32.xlu1 %v56_v3, %s70_s19 }
   0xa   :  { %31 = vrot.lane.b32.xlu0 %v57_v5, %s71_s24  ;;  %37 = vrot.lane.b32.xlu1 %v58_v6, %s72_s25 }
   0xe   :  { %43 = vrot.lane.b32.xlu0 %v59_v7, %s73_s0 }
  0x74   :  { %v8_v8 = vpop.permute.xlu0 %7   ;;  %v20_v9 = vpop.permute.xlu1 %19  }
  0x75   :  { %10 = vst.msk [vmem:[#allocation0] sm:$0x1] %vm9_vm1, %v8_v8  }
  0x78   :  { %v14_v10 = vpop.permute.xlu0 %13   ;;  %v26_v11 = vpop.permute.xlu1 %25  }
  0x79   :  { %16 = vst.msk [vmem:[#allocation0] sm:$0x1] %vm15_vm2, %v14_v10  }
  0x7a   :  { %22 = vst.msk [vmem:[#allocation0] sm:$0x1] %vm21_vm3, %v20_v9  }
  0x7b   :  { %28 = vst.msk [vmem:[#allocation0] sm:$0x1] %vm27_vm4, %v26_v11  }
  0x7c   :  { %v32_v12 = vpop.permute.xlu0 %31   ;;  %v38_v13 = vpop.permute.xlu1 %37  }
  0x7d   :  { %34 = vst.msk [vmem:[#allocation0] sm:$0x1] %vm33_vm5, %v32_v12  }
  0x7e   :  { %40 = vst.msk [vmem:[#allocation0] sm:$0x1] %vm39_vm6, %v38_v13  }
  0x80   :  { %v44_v14 = vpop.permute.xlu0 %43  }
  0x81   :  { %46 = vst.msk [vmem:[#allocation0] sm:$0x1] %vm45_vm7, %v44_v14  }
  0x88   :  { %v50_v15 = vld [vmem:[#allocation0] sm:$0x1] }
  0x89   :  { %52 = vst [vmem:[%s112_s1] sm:$0x1] %v50_v15 }

// kernel: generator_forward.11
= control target key start
LH: loop header
LB: loop body
LE: loop exit
PB: predicated region body
PF: predicated region fallthrough
CT: control target
= control target key end

     0   :  { %s225_s9 = smov 0   ;;  %s253_s0 = inlined_call_operand.vmem [shape: f32[16,128], index: 0, kind: input, shape index: {}]   ;;  %s254_s1 = inlined_call_operand.vmem [shape: f32[1,128], index: 1, kind: input, shape index: {}]   ;;  %s255_s2 = inlined_call_operand.vmem [shape: f32[16,128], index: 2, kind: output, shape index: {}]  }
   0x1 LB: > { %s203_s10 = sadd.s32 4294967295, %s227_s9   ;;  %p207_p0 = scmp.ge.s32.totalorder %s227_s9, 1  ;;  %s227_s9 = sphi %s225_s9, %s12_s9  }
   0x2   : > { %p111_p1 = scmp.lt.s32.totalorder %s227_s9, 3 }
   0x4   : > { %p112_p2 = pnand %p207_p0, %p111_p1 }
   0x5   : > { %p131_p3 = scmp.lt.s32.totalorder (!%p112_p2), %s203_s10, 1  ;;  %v210_v0 = vld [vmem:[%s254_s1] ss:$0 sm:$0xff] (!%p112_p2) }
   0x6   : > { %115 = sbr.rel (%p112_p2) target bundleno = 22 (0x16), region = 28 }
   0xd   : > { %s257_s10 = smov (!%p131_p3, %s203_s10), 1 }
   0xe   : > { %s208_s11 = sshll.u32 %s257_s10, 3 }
   0xf   : > { %s134_s16 = scalar_lea.vmem %s253_s0, %s208_s11  ;;  %s138_s19 = scalar_lea.vmem %s255_s2, %s208_s11 }
  0x10   : > { %v139_v1 = vld [vmem:[%s134_s16] sm:$0xff] }
  0x11   : > { %v147_v2 = vadd.f32 %v210_v0, %v139_v1 }
  0x13   : > { %v148_v3 = vmax.f32 %v147_v2, 0.0 }
  0x15   : > { %149 = vst [vmem:[%s138_s19] sm:$0xff] %v148_v3 }
  0x16 PF: > { %s12_s9 = sadd.s32 1, %s227_s9  }
  0x17   : > { %p9_p4 = scmp.ge.s32.totalorder %s12_s9, 4  }
  0x19   :  { %11 = sbr.rel (!%p9_p4) target bundleno = 1 (0x1), region = 58 }

// kernel: generator_forward.12
= control target key start
LH: loop header
LB: loop body
LE: loop exit
PB: predicated region body
PF: predicated region fallthrough
CT: control target
= control target key end

     0   :  { %s439_s12 = smov 0   ;;  %s462_s0 = inlined_call_operand.vmem [shape: bf16[128,16], index: 0, kind: input, shape index: {}]   ;;  %s463_s1 = inlined_call_operand.vmem [shape: bf16[16,128], index: 1, kind: input, shape index: {}]   ;;  %s464_s2 = inlined_call_operand.vmem [shape: f32[1,128], index: 2, kind: input, shape index: {}]   ;;  %s465_s3 = inlined_call_operand.vmem [shape: f32[128,128], index: 3, kind: output, shape index: {}]  }
   0x1 LB: > { %s360_s13 = sadd.s32 4294967295, %s417_s12   ;;  %p364_p0 = scmp.ge.s32.totalorder %s417_s12, 1  ;;  %s417_s12 = sphi %s439_s12, %s13_s12  }
   0x2   : > { %p138_p1 = scmp.lt.s32.totalorder %s417_s12, 3 }
   0x4   : > { %p139_p2 = pnand %p364_p0, %p138_p1 }
   0x5   : > { %v406_v0 = vld [vmem:[%s463_s1] sm:$0xff] (!%p139_p2)   ;;  %s365_s16 = sshll.u32 (!%p139_p2), %s360_s13, 3  ;;  %vm218_vm0 = vcmask (!%p139_p2), 130048  }
   0x6   : > { %142 = sbr.rel (%p139_p2) target bundleno = 236 (0xec), region = 32  ;;  %p163_p3 = scmp.lt.s32.totalorder (!%p139_p2), %s365_s16, 15  ;;  %386 = vmatprep.subr.bf16.mxu0 (!%p139_p2), %v406_v0  ;;  %396 = vmatprep.subr.bf16.mxu1 (!%p139_p2), %v406_v0  ;;  %v369_v5 = vld [vmem:[%s464_s2] ss:$0 sm:$0xff] (!%p139_p2) }
   0x7   : > { %387 = vmatpush3.bf16.msra.mxu0 (!%p139_p2), %v406_v0  ;;  %397 = vmatpush3.bf16.msra.mxu1 (!%p139_p2), %v406_v0 }
   0xd   : > { %s467_s16 = smov (!%p163_p3, %s365_s16), 15 }
   0xe   : > { %s366_s17 = sshll.u32 %s467_s16, 2  ;;  %s368_s21 = sshll.u32 %s467_s16, 3 }
   0xf   : > { %s166_s20 = scalar_lea.vmem %s462_s0, %s366_s17  ;;  %s172_s26 = scalar_lea.vmem %s465_s3, %s368_s21 }
  0x10   : > { %v407_v1 = vld [vmem:[%s166_s20] sm:$0xff]   ;;  %v408_v2 = vld [vmem:[%s166_s20 + $0x10] sm:$0xff]   ;;  %v409_v3 = vld [vmem:[%s166_s20 + $0x8] sm:$0xff]  }
  0x11   : > { %388 = vmatprep.mubr.msk.bf16.mxu0 %vm218_vm0, %v407_v1  ;;  %392 = vmatprep.mubr.msk.bf16.mxu1 %vm218_vm0, %v408_v2  ;;  %v410_v4 = vld [vmem:[%s166_s20 + $0x18] sm:$0xff]  }
  0x12   : > { %389 = vmatmul.mubr.msk.bf16.vlgmr.msra.gmra.mrb[0].mxu0 %vm218_vm0, %v409_v3  ;;  %393 = vmatmul.mubr.msk.bf16.vlgmr.msra.gmra.mrb[0].mxu1 %vm218_vm0, %v410_v4 }
  0xe5   : > { %v390_v6 = vpop.f32.mrb[0].mxu0  ;;  %v394_v8 = vpop.f32.mrb[0].mxu1 }
  0xe6   : > { %v274_v7 = vadd.f32 %v390_v6, %v369_v5  ;;  %v265_v9 = vpop.f32.mrb[1].mxu0  ;;  %v290_v10 = vadd.f32 %v394_v8, %v369_v5  ;;  %v281_v12 = vpop.f32.mrb[1].mxu1 }
  0xe7   : > { %v266_v11 = vadd.f32 %v369_v5, %v265_v9  ;;  %v391_v13 = vpop.f32.mrb[2].mxu0  ;;  %v282_v14 = vadd.f32 %v369_v5, %v281_v12  ;;  %v395_v16 = vpop.f32.mrb[2].mxu1 }
  0xe8   : > { %298 = vst [vmem:[%s172_s26 + $0x10] sm:$0xff] %v274_v7  ;;  %v277_v15 = vadd.f32 %v391_v13, %v369_v5  ;;  %v268_v17 = vpop.f32.mrb[3].mxu0  ;;  %302 = vst [vmem:[%s172_s26 + $0x30] sm:$0xff] %v290_v10  ;;  %v293_v18 = vadd.f32 %v395_v16, %v369_v5  ;;  %v284_v20 = vpop.f32.mrb[3].mxu1 }
  0xe9   : > { %296 = vst [vmem:[%s172_s26] sm:$0xff] %v266_v11  ;;  %v269_v19 = vadd.f32 %v369_v5, %v268_v17  ;;  %300 = vst [vmem:[%s172_s26 + $0x20] sm:$0xff] %v282_v14  ;;  %v285_v21 = vadd.f32 %v369_v5, %v284_v20 }
  0xea   : > { %299 = vst [vmem:[%s172_s26 + $0x18] sm:$0xff] %v277_v15  ;;  %303 = vst [vmem:[%s172_s26 + $0x38] sm:$0xff] %v293_v18 }
  0xeb   : > { %297 = vst [vmem:[%s172_s26 + $0x8] sm:$0xff] %v269_v19  ;;  %301 = vst [vmem:[%s172_s26 + $0x28] sm:$0xff] %v285_v21 }
  0xec PF: > { %s13_s12 = sadd.s32 1, %s417_s12  }
  0xed   : > { %p10_p4 = scmp.ge.s32.totalorder %s13_s12, 4  }
  0xef   :  { %12 = sbr.rel (!%p10_p4) target bundleno = 1 (0x1), region = 62 }

// kernel: tile.38
= control target key start
LH: loop header
LB: loop body
LE: loop exit
PB: predicated region body
PF: predicated region fallthrough
CT: control target
= control target key end

     0   :  { %s28_s0 = inlined_call_operand.vmem [shape: f32[8], index: 0, kind: input, shape index: {}]   ;;  %s29_s1 = inlined_call_operand.vmem [shape: f32[16,8], index: 1, kind: output, shape index: {}]  }
   0x1   :  { %v4_v0 = vld [vmem:[%s28_s0] ss:$0 sm:$0xff] }
   0x2   :  { %5 = vst [vmem:[%s29_s1] sm:$0xff] %v4_v0  ;;  %8 = vst [vmem:[%s29_s1 + $0x8] sm:$0xff] %v4_v0 }

// kernel: tile.39
= control target key start
LH: loop header
LB: loop body
LE: loop exit
PB: predicated region body
PF: predicated region fallthrough
CT: control target
= control target key end

     0   :  { %s131_s10 = smov 120   ;;  %s132_s11 = smov 104   ;;  %vm3_vm0 = vcmask 64512   ;;  %vm9_vm1 = vcmask 1048512   ;;  %vm15_vm2 = vcmask 982912   ;;  %vm21_vm3 = vcmask 917312   ;;  %s207_s0 = inlined_call_operand.vmem [shape: f32[16,8], index: 0, kind: input, shape index: {}]   ;;  %s208_s1 = inlined_call_operand.vmem [shape: f32[1,128], index: 1, kind: output, shape index: {}]  }
   0x1   :  { %v101_v0 = vld [vmem:[%s207_s0 + $0xf] sm:$0x1]   ;;  %v103_v1 = vld [vmem:[%s207_s0 + $0xd] sm:$0x1]   ;;  %v102_v2 = vld [vmem:[%s207_s0 + $0xe] sm:$0x1]  }
   0x2   :  { %7 = vrot.lane.b32.xlu0 %v101_v0, %s131_s10  ;;  %19 = vrot.lane.b32.xlu1 %v103_v1, %s132_s11  ;;  %v104_v3 = vld [vmem:[%s207_s0 + $0xc] sm:$0x1]   ;;  %s133_s16 = smov 112   ;;  %s134_s17 = smov 96   ;;  %v105_v4 = vld [vmem:[%s207_s0 + $0xb] sm:$0x1]  }
   0x3   :  { %v106_v5 = vld [vmem:[%s207_s0 + $0xa] sm:$0x1]   ;;  %v2_v6 = vld [vmem:[%s207_s0] sm:$0x1]   ;;  %s135_s24 = smov 88   ;;  %s136_s25 = smov 80  }
   0x4   :  { %4 = vst.msk [vmem:[#allocation0] sm:$0x1] %vm3_vm0, %v2_v6   ;;  %v107_v7 = vld [vmem:[%s207_s0 + $0x9] sm:$0x1]   ;;  %v108_v8 = vld [vmem:[%s207_s0 + $0x8] sm:$0x1]  }
   0x5   :  { %s137_s30 = smov 72   ;;  %s138_s2 = smov 64   ;;  %v109_v9 = vld [vmem:[%s207_s0 + $0x7] sm:$0x1]   ;;  %v110_v10 = vld [vmem:[%s207_s0 + $0x6] sm:$0x1]  }
   0x6   :  { %13 = vrot.lane.b32.xlu0 %v102_v2, %s133_s16  ;;  %25 = vrot.lane.b32.xlu1 %v104_v3, %s134_s17  ;;  %s139_s7 = smov 56   ;;  %s140_s8 = smov 48   ;;  %v111_v11 = vld [vmem:[%s207_s0 + $0x5] sm:$0x1]   ;;  %v112_v12 = vld [vmem:[%s207_s0 + $0x4] sm:$0x1]  }
   0x7   :  { %s141_s13 = smov 40   ;;  %s142_s14 = smov 32   ;;  %v113_v13 = vld [vmem:[%s207_s0 + $0x3] sm:$0x1]   ;;  %v114_v14 = vld [vmem:[%s207_s0 + $0x2] sm:$0x1]  }
   0x8   :  { %s143_s19 = smov 24   ;;  %s144_s20 = smov 16   ;;  %v115_v15 = vld [vmem:[%s207_s0 + $0x1] sm:$0x1]   ;;  %vm27_vm4 = vcmask 851712   ;;  %vm33_vm5 = vcmask 786112  }
   0x9   :  { %s145_s0 = smov 8   ;;  %vm39_vm6 = vcmask 720512   ;;  %vm45_vm7 = vcmask 654912   ;;  %vm51_vm8 = vcmask 589312   ;;  %vm57_vm9 = vcmask 523712  }
   0xa   :  { %31 = vrot.lane.b32.xlu0 %v105_v4, %s135_s24  ;;  %37 = vrot.lane.b32.xlu1 %v106_v5, %s136_s25  ;;  %vm63_vm10 = vcmask 458112   ;;  %vm69_vm11 = vcmask 392512   ;;  %vm75_vm12 = vcmask 326912   ;;  %vm81_vm13 = vcmask 261312  }
   0xb   :  { %vm87_vm14 = vcmask 195712   ;;  %vm93_vm15 = vcmask 130112  }
   0xe   :  { %43 = vrot.lane.b32.xlu0 %v107_v7, %s137_s30  ;;  %49 = vrot.lane.b32.xlu1 %v108_v8, %s138_s2 }
  0x12   :  { %55 = vrot.lane.b32.xlu0 %v109_v9, %s139_s7  ;;  %61 = vrot.lane.b32.xlu1 %v110_v10, %s140_s8 }
  0x16   :  { %67 = vrot.lane.b32.xlu0 %v111_v11, %s141_s13  ;;  %73 = vrot.lane.b32.xlu1 %v112_v12, %s142_s14 }
  0x1a   :  { %79 = vrot.lane.b32.xlu0 %v113_v13, %s143_s19  ;;  %85 = vrot.lane.b32.xlu1 %v114_v14, %s144_s20 }
  0x1e   :  { %91 = vrot.lane.b32.xlu0 %v115_v15, %s145_s0 }
  0x74   :  { %v8_v16 = vpop.permute.xlu0 %7   ;;  %v20_v17 = vpop.permute.xlu1 %19  }
  0x75   :  { %10 = vst.msk [vmem:[#allocation0] sm:$0x1] %vm9_vm1, %v8_v16  }
  0x78   :  { %v14_v18 = vpop.permute.xlu0 %13   ;;  %v26_v19 = vpop.permute.xlu1 %25  }
  0x79   :  { %16 = vst.msk [vmem:[#allocation0] sm:$0x1] %vm15_vm2, %v14_v18  }
  0x7a   :  { %22 = vst.msk [vmem:[#allocation0] sm:$0x1] %vm21_vm3, %v20_v17  }
  0x7b   :  { %28 = vst.msk [vmem:[#allocation0] sm:$0x1] %vm27_vm4, %v26_v19  }
  0x7c   :  { %v32_v20 = vpop.permute.xlu0 %31   ;;  %v38_v21 = vpop.permute.xlu1 %37  }
  0x7d   :  { %34 = vst.msk [vmem:[#allocation0] sm:$0x1] %vm33_vm5, %v32_v20  }
  0x7e   :  { %40 = vst.msk [vmem:[#allocation0] sm:$0x1] %vm39_vm6, %v38_v21  }
  0x80   :  { %v44_v22 = vpop.permute.xlu0 %43   ;;  %v50_v23 = vpop.permute.xlu1 %49  }
  0x81   :  { %46 = vst.msk [vmem:[#allocation0] sm:$0x1] %vm45_vm7, %v44_v22  }
  0x82   :  { %52 = vst.msk [vmem:[#allocation0] sm:$0x1] %vm51_vm8, %v50_v23  }
  0x84   :  { %v56_v24 = vpop.permute.xlu0 %55   ;;  %v62_v25 = vpop.permute.xlu1 %61  }
  0x85   :  { %58 = vst.msk [vmem:[#allocation0] sm:$0x1] %vm57_vm9, %v56_v24  }
  0x86   :  { %64 = vst.msk [vmem:[#allocation0] sm:$0x1] %vm63_vm10, %v62_v25  }
  0x88   :  { %v68_v26 = vpop.permute.xlu0 %67   ;;  %v74_v27 = vpop.permute.xlu1 %73  }
  0x89   :  { %70 = vst.msk [vmem:[#allocation0] sm:$0x1] %vm69_vm11, %v68_v26  }
  0x8a   :  { %76 = vst.msk [vmem:[#allocation0] sm:$0x1] %vm75_vm12, %v74_v27  }
  0x8c   :  { %v80_v28 = vpop.permute.xlu0 %79   ;;  %v86_v29 = vpop.permute.xlu1 %85  }
  0x8d   :  { %82 = vst.msk [vmem:[#allocation0] sm:$0x1] %vm81_vm13, %v80_v28  }
  0x8e   :  { %88 = vst.msk [vmem:[#allocation0] sm:$0x1] %vm87_vm14, %v86_v29  }
  0x90   :  { %v92_v30 = vpop.permute.xlu0 %91  }
  0x91   :  { %94 = vst.msk [vmem:[#allocation0] sm:$0x1] %vm93_vm15, %v92_v30  }
  0x98   :  { %v98_v31 = vld [vmem:[#allocation0] sm:$0x1] }
  0x99   :  { %100 = vst [vmem:[%s208_s1] sm:$0x1] %v98_v31 }

// kernel: generator_forward.13
= control target key start
LH: loop header
LB: loop body
LE: loop exit
PB: predicated region body
PF: predicated region fallthrough
CT: control target
= control target key end

     0   :  { %s242_s9 = smov 0   ;;  %s270_s0 = inlined_call_operand.vmem [shape: f32[32,128], index: 0, kind: input, shape index: {}]   ;;  %s271_s1 = inlined_call_operand.vmem [shape: f32[1,128], index: 1, kind: input, shape index: {}]   ;;  %s272_s2 = inlined_call_operand.vmem [shape: f32[32,128], index: 2, kind: output, shape index: {}]  }
   0x1 LB: > { %s218_s10 = sadd.s32 4294967295, %s244_s9   ;;  %p222_p0 = scmp.ge.s32.totalorder %s244_s9, 1  ;;  %s244_s9 = sphi %s242_s9, %s12_s9  }
   0x2   : > { %p113_p1 = scmp.lt.s32.totalorder %s244_s9, 3 }
   0x4   : > { %p114_p2 = pnand %p222_p0, %p113_p1 }
   0x5   : > { %s223_s11 = sshll.u32 (!%p114_p2), %s218_s10, 1  ;;  %v227_v0 = vld [vmem:[%s271_s1] ss:$0 sm:$0xff] (!%p114_p2) }
   0x6   : > { %117 = sbr.rel (%p114_p2) target bundleno = 22 (0x16), region = 28  ;;  %p136_p3 = scmp.lt.s32.totalorder (!%p114_p2), %s223_s11, 3 }
   0xd   : > { %s274_s11 = smov (!%p136_p3, %s223_s11), 3 }
   0xe   : > { %s224_s12 = sshll.u32 %s274_s11, 3 }
   0xf   : > { %s139_s17 = scalar_lea.vmem %s270_s0, %s224_s12  ;;  %s145_s20 = scalar_lea.vmem %s272_s2, %s224_s12 }
  0x10   : > { %v147_v1 = vld [vmem:[%s139_s17] sm:$0xff]  ;;  %v148_v2 = vld [vmem:[%s139_s17 + $0x8] sm:$0xff] }
  0x11   : > { %v156_v3 = vadd.f32 %v227_v0, %v147_v1  ;;  %v157_v4 = vadd.f32 %v227_v0, %v148_v2 }
  0x13   : > { %v158_v5 = vmax.f32 %v156_v3, 0.0  ;;  %v159_v6 = vmax.f32 %v157_v4, 0.0 }
  0x15   : > { %160 = vst [vmem:[%s145_s20] sm:$0xff] %v158_v5  ;;  %161 = vst [vmem:[%s145_s20 + $0x8] sm:$0xff] %v159_v6 }
  0x16 PF: > { %s12_s9 = sadd.s32 1, %s244_s9  }
  0x17   : > { %p9_p4 = scmp.ge.s32.totalorder %s12_s9, 4  }
  0x19   :  { %11 = sbr.rel (!%p9_p4) target bundleno = 1 (0x1), region = 58 }

// kernel: generator_forward.14
= control target key start
LH: loop header
LB: loop body
LE: loop exit
PB: predicated region body
PF: predicated region fallthrough
CT: control target
= control target key end

     0   :  { %s749_s12 = smov 0   ;;  %s910_s0 = inlined_call_operand.vmem [shape: bf16[512,8], index: 0, kind: input, shape index: {}]   ;;  %s911_s1 = inlined_call_operand.vmem [shape: bf16[8,64], index: 1, kind: input, shape index: {}]   ;;  %s912_s2 = inlined_call_operand.vmem [shape: f32[1,64], index: 2, kind: input, shape index: {}]   ;;  %s913_s3 = inlined_call_operand.vmem [shape: f32[512,64], index: 3, kind: output, shape index: {}]  }
   0x1 LB: > { %s598_s13 = sadd.s32 4294967295, %s727_s12   ;;  %p602_p0 = scmp.ge.s32.totalorder %s727_s12, 1  ;;  %s727_s12 = sphi %s749_s12, %s13_s12  }
   0x2   : > { %p138_p1 = scmp.lt.s32.totalorder %s727_s12, 3 }
   0x4   : > { %p139_p2 = pnand %p602_p0, %p138_p1 }
   0x5   : > { %v207_v0 = vld [vmem:[%s911_s1] sm:$0xf] (!%p139_p2)  ;;  %vm344_vm0 = vcmask (!%p139_p2), 1043456   ;;  %s603_s16 = sshll.u32 (!%p139_p2), %s598_s13, 5  ;;  %vm295_vm1 = vcmask (!%p139_p2), 64512   ;;  %vm509_vm2 = vcmask (!%p139_p2), 523264  }
   0x6   : > { %142 = sbr.rel (%p139_p2) target bundleno = 261 (0x105), region = 32  ;;  %695 = vmatprep.subr.msk.bf16.mxu0 (!%p139_p2), %vm344_vm0, %v207_v0  ;;  %696 = vmatprep.subr.msk.bf16.mxu1 (!%p139_p2), %vm344_vm0, %v207_v0  ;;  %v346_v1 = vsel (!%p139_p2), %vm344_vm0, %v207_v0, 0  ;;  %p163_p3 = scmp.lt.s32.totalorder (!%p139_p2), %s603_s16, 63  ;;  %v804_v18 = vld [vmem:[%s912_s2] ss:$0 sm:$0xff] (!%p139_p2) }
   0x7   : > { %660 = vmatpush3.bf16.msra.mxu0 (!%p139_p2), %v346_v1  ;;  %694 = vmatpush3.bf16.msra.mxu1 (!%p139_p2), %v346_v1 }
   0xd   : > { %s915_s16 = smov (!%p163_p3, %s603_s16), 63 }
   0xe   : > { %s604_s17 = sshll.u32 %s915_s16, 2  ;;  %s606_s21 = sshll.u32 %s915_s16, 3 }
   0xf   : > { %s766_s20 = scalar_lea.vmem %s910_s0, %s604_s17  ;;  %s809_s26 = scalar_lea.vmem %s913_s3, %s606_s21 }
  0x10   : > { %v705_v2 = vld [vmem:[%s766_s20] sm:$0xff]   ;;  %v707_v4 = vld [vmem:[%s766_s20 + $0x8] sm:$0xff]   ;;  %v709_v6 = vld [vmem:[%s766_s20 + $0x10] sm:$0xff]  }
  0x11   : > { %v706_v3 = vld [vmem:[%s766_s20 + $0x40] sm:$0xff]   ;;  %661 = vmatprep.mubr.msk.bf16.mxu0 %vm295_vm1, %v705_v2  ;;  %v708_v5 = vld [vmem:[%s766_s20 + $0x48] sm:$0xff]   ;;  %v710_v7 = vld [vmem:[%s766_s20 + $0x50] sm:$0xff]  }
  0x12   : > { %677 = vmatprep.mubr.msk.bf16.mxu1 %vm295_vm1, %v706_v3  ;;  %662 = vmatmul.mubr.msk.bf16.vlgmr.msra.gmra.mrb[0].mxu0 %vm295_vm1, %v707_v4  ;;  %v711_v8 = vld [vmem:[%s766_s20 + $0x18] sm:$0xff]   ;;  %v713_v10 = vld [vmem:[%s766_s20 + $0x20] sm:$0xff]   ;;  %v715_v12 = vld [vmem:[%s766_s20 + $0x28] sm:$0xff]  }
  0x13   : > { %678 = vmatmul.mubr.msk.bf16.vlgmr.msra.gmra.mrb[0].mxu1 %vm295_vm1, %v708_v5  ;;  %665 = vmatprep.mubr.msk.bf16.mxu0 %vm295_vm1, %v709_v6  ;;  %v712_v9 = vld [vmem:[%s766_s20 + $0x58] sm:$0xff]   ;;  %v714_v11 = vld [vmem:[%s766_s20 + $0x60] sm:$0xff]   ;;  %v716_v13 = vld [vmem:[%s766_s20 + $0x68] sm:$0xff]  }
  0x14   : > { %681 = vmatprep.mubr.msk.bf16.mxu1 %vm295_vm1, %v710_v7  ;;  %v717_v14 = vld [vmem:[%s766_s20 + $0x30] sm:$0xff]   ;;  %v719_v16 = vld [vmem:[%s766_s20 + $0x38] sm:$0xff]  }
  0x15   : > { %v718_v15 = vld [vmem:[%s766_s20 + $0x70] sm:$0xff]   ;;  %v720_v17 = vld [vmem:[%s766_s20 + $0x78] sm:$0xff]  }
  0x1a   : > { %666 = vmatmul.mubr.msk.bf16.gmra.mrb[4].mxu0 %vm295_vm1, %v711_v8 }
  0x1b   : > { %682 = vmatmul.mubr.msk.bf16.gmra.mrb[4].mxu1 %vm295_vm1, %v712_v9  ;;  %669 = vmatprep.mubr.msk.bf16.mxu0 %vm295_vm1, %v713_v10 }
  0x1c   : > { %685 = vmatprep.mubr.msk.bf16.mxu1 %vm295_vm1, %v714_v11 }
  0x22   : > { %670 = vmatmul.mubr.msk.bf16.gmra.mrb[8].mxu0 %vm295_vm1, %v715_v12 }
  0x23   : > { %686 = vmatmul.mubr.msk.bf16.gmra.mrb[8].mxu1 %vm295_vm1, %v716_v13  ;;  %673 = vmatprep.mubr.msk.bf16.mxu0 %vm295_vm1, %v717_v14 }
  0x24   : > { %689 = vmatprep.mubr.msk.bf16.mxu1 %vm295_vm1, %v718_v15 }
  0x2a   : > { %674 = vmatmul.mubr.msk.bf16.gmra.mrb[12].mxu0 %vm295_vm1, %v719_v16 }
  0x2b   : > { %690 = vmatmul.mubr.msk.bf16.gmra.mrb[12].mxu1 %vm295_vm1, %v720_v17 }
  0xe5   : > { %v663_v19 = vpop.f32.mrb[0].mxu0 }
  0xe6   : > { %v391_v20 = vadd.f32 %v663_v19, %v804_v18  ;;  %v679_v21 = vpop.f32.mrb[0].mxu1  ;;  %v382_v22 = vpop.f32.mrb[1].mxu0 }
  0xe7   : > { %v455_v23 = vadd.f32 %v679_v21, %v804_v18  ;;  %v383_v24 = vadd.f32 %v804_v18, %v382_v22  ;;  %v446_v25 = vpop.f32.mrb[1].mxu1  ;;  %v664_v26 = vpop.f32.mrb[2].mxu0 }
  0xe8   : > { %512 = vst.msk [vmem:[%s809_s26 + $0x10] sm:$0xff] %vm509_vm2, %v391_v20  ;;  %v447_v27 = vadd.f32 %v804_v18, %v446_v25  ;;  %v394_v28 = vadd.f32 %v664_v26, %v804_v18  ;;  %v680_v29 = vpop.f32.mrb[2].mxu1  ;;  %v385_v30 = vpop.f32.mrb[3].mxu0 }
  0xe9   : > { %528 = vst.msk [vmem:[%s809_s26 + $0x90] sm:$0xff] %vm509_vm2, %v455_v23  ;;  %510 = vst.msk [vmem:[%s809_s26] sm:$0xff] %vm509_vm2, %v383_v24  ;;  %v458_v31 = vadd.f32 %v680_v29, %v804_v18  ;;  %v386_v32 = vadd.f32 %v804_v18, %v385_v30  ;;  %v449_v33 = vpop.f32.mrb[3].mxu1 }
  0xea   : > { %526 = vst.msk [vmem:[%s809_s26 + $0x80] sm:$0xff] %vm509_vm2, %v447_v27  ;;  %513 = vst.msk [vmem:[%s809_s26 + $0x18] sm:$0xff] %vm509_vm2, %v394_v28  ;;  %v450_v34 = vadd.f32 %v804_v18, %v449_v33 }
  0xeb   : > { %529 = vst.msk [vmem:[%s809_s26 + $0x98] sm:$0xff] %vm509_vm2, %v458_v31  ;;  %511 = vst.msk [vmem:[%s809_s26 + $0x8] sm:$0xff] %vm509_vm2, %v386_v32 }
  0xec   : > { %527 = vst.msk [vmem:[%s809_s26 + $0x88] sm:$0xff] %vm509_vm2, %v450_v34 }
  0xed   : > { %v667_v35 = vpop.f32.mrb[4].mxu0 }
  0xee   : > { %v407_v36 = vadd.f32 %v667_v35, %v804_v18  ;;  %v683_v37 = vpop.f32.mrb[4].mxu1  ;;  %v398_v38 = vpop.f32.mrb[5].mxu0 }
  0xef   : > { %v471_v39 = vadd.f32 %v683_v37, %v804_v18  ;;  %v399_v40 = vadd.f32 %v804_v18, %v398_v38  ;;  %v462_v41 = vpop.f32.mrb[5].mxu1  ;;  %v668_v42 = vpop.f32.mrb[6].mxu0 }
  0xf0   : > { %516 = vst.msk [vmem:[%s809_s26 + $0x30] sm:$0xff] %vm509_vm2, %v407_v36  ;;  %v463_v43 = vadd.f32 %v804_v18, %v462_v41  ;;  %v410_v44 = vadd.f32 %v668_v42, %v804_v18  ;;  %v684_v45 = vpop.f32.mrb[6].mxu1  ;;  %v401_v46 = vpop.f32.mrb[7].mxu0 }
  0xf1   : > { %532 = vst.msk [vmem:[%s809_s26 + $0xb0] sm:$0xff] %vm509_vm2, %v471_v39  ;;  %514 = vst.msk [vmem:[%s809_s26 + $0x20] sm:$0xff] %vm509_vm2, %v399_v40  ;;  %v474_v47 = vadd.f32 %v684_v45, %v804_v18  ;;  %v402_v48 = vadd.f32 %v804_v18, %v401_v46  ;;  %v465_v49 = vpop.f32.mrb[7].mxu1 }
  0xf2   : > { %530 = vst.msk [vmem:[%s809_s26 + $0xa0] sm:$0xff] %vm509_vm2, %v463_v43  ;;  %517 = vst.msk [vmem:[%s809_s26 + $0x38] sm:$0xff] %vm509_vm2, %v410_v44  ;;  %v466_v50 = vadd.f32 %v804_v18, %v465_v49 }
  0xf3   : > { %533 = vst.msk [vmem:[%s809_s26 + $0xb8] sm:$0xff] %vm509_vm2, %v474_v47  ;;  %515 = vst.msk [vmem:[%s809_s26 + $0x28] sm:$0xff] %vm509_vm2, %v402_v48 }
  0xf4   : > { %531 = vst.msk [vmem:[%s809_s26 + $0xa8] sm:$0xff] %vm509_vm2, %v466_v50 }
  0xf5   : > { %v671_v51 = vpop.f32.mrb[8].mxu0 }
  0xf6   : > { %v423_v52 = vadd.f32 %v671_v51, %v804_v18  ;;  %v687_v53 = vpop.f32.mrb[8].mxu1  ;;  %v414_v54 = vpop.f32.mrb[9].mxu0 }
  0xf7   : > { %v487_v55 = vadd.f32 %v687_v53, %v804_v18  ;;  %v415_v56 = vadd.f32 %v804_v18, %v414_v54  ;;  %v478_v57 = vpop.f32.mrb[9].mxu1  ;;  %v672_v58 = vpop.f32.mrb[10].mxu0 }
  0xf8   : > { %520 = vst.msk [vmem:[%s809_s26 + $0x50] sm:$0xff] %vm509_vm2, %v423_v52  ;;  %v479_v59 = vadd.f32 %v804_v18, %v478_v57  ;;  %v426_v60 = vadd.f32 %v672_v58, %v804_v18  ;;  %v688_v61 = vpop.f32.mrb[10].mxu1  ;;  %v417_v62 = vpop.f32.mrb[11].mxu0 }
  0xf9   : > { %536 = vst.msk [vmem:[%s809_s26 + $0xd0] sm:$0xff] %vm509_vm2, %v487_v55  ;;  %518 = vst.msk [vmem:[%s809_s26 + $0x40] sm:$0xff] %vm509_vm2, %v415_v56  ;;  %v490_v63 = vadd.f32 %v688_v61, %v804_v18  ;;  %v418_v0 = vadd.f32 %v804_v18, %v417_v62  ;;  %v481_v1 = vpop.f32.mrb[11].mxu1 }
  0xfa   : > { %534 = vst.msk [vmem:[%s809_s26 + $0xc0] sm:$0xff] %vm509_vm2, %v479_v59  ;;  %521 = vst.msk [vmem:[%s809_s26 + $0x58] sm:$0xff] %vm509_vm2, %v426_v60  ;;  %v482_v2 = vadd.f32 %v804_v18, %v481_v1 }
  0xfb   : > { %537 = vst.msk [vmem:[%s809_s26 + $0xd8] sm:$0xff] %vm509_vm2, %v490_v63  ;;  %519 = vst.msk [vmem:[%s809_s26 + $0x48] sm:$0xff] %vm509_vm2, %v418_v0 }
  0xfc   : > { %535 = vst.msk [vmem:[%s809_s26 + $0xc8] sm:$0xff] %vm509_vm2, %v482_v2 }
  0xfd   : > { %v675_v3 = vpop.f32.mrb[12].mxu0 }
  0xfe   : > { %v439_v4 = vadd.f32 %v675_v3, %v804_v18  ;;  %v691_v5 = vpop.f32.mrb[12].mxu1  ;;  %v430_v6 = vpop.f32.mrb[13].mxu0 }
  0xff   : > { %v503_v7 = vadd.f32 %v691_v5, %v804_v18  ;;  %v431_v8 = vadd.f32 %v804_v18, %v430_v6  ;;  %v494_v9 = vpop.f32.mrb[13].mxu1  ;;  %v676_v10 = vpop.f32.mrb[14].mxu0 }
 0x100   : > { %524 = vst.msk [vmem:[%s809_s26 + $0x70] sm:$0xff] %vm509_vm2, %v439_v4  ;;  %v495_v11 = vadd.f32 %v804_v18, %v494_v9  ;;  %v442_v12 = vadd.f32 %v676_v10, %v804_v18  ;;  %v692_v13 = vpop.f32.mrb[14].mxu1  ;;  %v433_v14 = vpop.f32.mrb[15].mxu0 }
 0x101   : > { %540 = vst.msk [vmem:[%s809_s26 + $0xf0] sm:$0xff] %vm509_vm2, %v503_v7  ;;  %522 = vst.msk [vmem:[%s809_s26 + $0x60] sm:$0xff] %vm509_vm2, %v431_v8  ;;  %v506_v15 = vadd.f32 %v692_v13, %v804_v18  ;;  %v434_v16 = vadd.f32 %v804_v18, %v433_v14  ;;  %v497_v17 = vpop.f32.mrb[15].mxu1 }
 0x102   : > { %538 = vst.msk [vmem:[%s809_s26 + $0xe0] sm:$0xff] %vm509_vm2, %v495_v11  ;;  %525 = vst.msk [vmem:[%s809_s26 + $0x78] sm:$0xff] %vm509_vm2, %v442_v12  ;;  %v498_v19 = vadd.f32 %v804_v18, %v497_v17 }
 0x103   : > { %541 = vst.msk [vmem:[%s809_s26 + $0xf8] sm:$0xff] %vm509_vm2, %v506_v15  ;;  %523 = vst.msk [vmem:[%s809_s26 + $0x68] sm:$0xff] %vm509_vm2, %v434_v16 }
 0x104   : > { %539 = vst.msk [vmem:[%s809_s26 + $0xe8] sm:$0xff] %vm509_vm2, %v498_v19 }
 0x105 PF: > { %s13_s12 = sadd.s32 1, %s727_s12  }
 0x106   : > { %p10_p4 = scmp.ge.s32.totalorder %s13_s12, 4  }
 0x108   :  { %12 = sbr.rel (!%p10_p4) target bundleno = 1 (0x1), region = 62 }

// kernel: tile.43
= control target key start
LH: loop header
LB: loop body
LE: loop exit
PB: predicated region body
PF: predicated region fallthrough
CT: control target
= control target key end

     0   :  { %s40_s0 = inlined_call_operand.vmem [shape: f32[4], index: 0, kind: input, shape index: {}]   ;;  %s41_s1 = inlined_call_operand.vmem [shape: f32[32,4], index: 1, kind: output, shape index: {}]  }
   0x1   :  { %v4_v0 = vld [vmem:[%s40_s0] ss:$0 sm:$0xff] }
   0x2   :  { %5 = vst [vmem:[%s41_s1] sm:$0xff] %v4_v0  ;;  %12 = vst [vmem:[%s41_s1 + $0x8] sm:$0xff] %v4_v0 }
   0x3   :  { %13 = vst [vmem:[%s41_s1 + $0x10] sm:$0xff] %v4_v0  ;;  %14 = vst [vmem:[%s41_s1 + $0x18] sm:$0xff] %v4_v0 }

// kernel: tile.44
= control target key start
LH: loop header
LB: loop body
LE: loop exit
PB: predicated region body
PF: predicated region fallthrough
CT: control target
= control target key end

     0   :  { %s259_s10 = smov 124   ;;  %s260_s11 = smov 116   ;;  %vm3_vm0 = vcmask 31744   ;;  %vm9_vm1 = vcmask 1048544   ;;  %vm15_vm2 = vcmask 1015744   ;;  %vm21_vm3 = vcmask 982944   ;;  %s399_s0 = inlined_call_operand.vmem [shape: f32[32,4], index: 0, kind: input, shape index: {}]   ;;  %s400_s1 = inlined_call_operand.vmem [shape: f32[1,128], index: 1, kind: output, shape index: {}]  }
   0x1   :  { %v197_v0 = vld [vmem:[%s399_s0 + $0x1f] sm:$0x1]   ;;  %v199_v1 = vld [vmem:[%s399_s0 + $0x1d] sm:$0x1]   ;;  %v198_v2 = vld [vmem:[%s399_s0 + $0x1e] sm:$0x1]  }
   0x2   :  { %7 = vrot.lane.b32.xlu0 %v197_v0, %s259_s10  ;;  %19 = vrot.lane.b32.xlu1 %v199_v1, %s260_s11  ;;  %v200_v3 = vld [vmem:[%s399_s0 + $0x1c] sm:$0x1]   ;;  %s261_s16 = smov 120   ;;  %s262_s17 = smov 112   ;;  %v201_v4 = vld [vmem:[%s399_s0 + $0x1b] sm:$0x1]  }
   0x3   :  { %v202_v5 = vld [vmem:[%s399_s0 + $0x1a] sm:$0x1]   ;;  %s263_s22 = smov 108   ;;  %s264_s23 = smov 104   ;;  %v203_v6 = vld [vmem:[%s399_s0 + $0x19] sm:$0x1]  }
   0x4   :  { %v204_v7 = vld [vmem:[%s399_s0 + $0x18] sm:$0x1]   ;;  %s265_s28 = smov 100   ;;  %s266_s29 = smov 96   ;;  %v205_v8 = vld [vmem:[%s399_s0 + $0x17] sm:$0x1]  }
   0x5   :  { %v206_v9 = vld [vmem:[%s399_s0 + $0x16] sm:$0x1]   ;;  %v2_v10 = vld [vmem:[%s399_s0] sm:$0x1]   ;;  %s267_s7 = smov 92   ;;  %s268_s8 = smov 88  }
   0x6   :  { %13 = vrot.lane.b32.xlu0 %v198_v2, %s261_s16  ;;  %25 = vrot.lane.b32.xlu1 %v200_v3, %s262_s17  ;;  %4 = vst.msk [vmem:[#allocation0] sm:$0x1] %vm3_vm0, %v2_v10   ;;  %v207_v11 = vld [vmem:[%s399_s0 + $0x15] sm:$0x1]   ;;  %v208_v12 = vld [vmem:[%s399_s0 + $0x14] sm:$0x1]  }
   0x7   :  { %s269_s13 = smov 84   ;;  %s270_s14 = smov 80   ;;  %v209_v13 = vld [vmem:[%s399_s0 + $0x13] sm:$0x1]   ;;  %v210_v14 = vld [vmem:[%s399_s0 + $0x12] sm:$0x1]  }
   0x8   :  { %s271_s19 = smov 76   ;;  %s272_s20 = smov 72   ;;  %v211_v15 = vld [vmem:[%s399_s0 + $0x11] sm:$0x1]   ;;  %v212_v16 = vld [vmem:[%s399_s0 + $0x10] sm:$0x1]  }
   0x9   :  { %s273_s25 = smov 68   ;;  %s274_s26 = smov 64   ;;  %v213_v17 = vld [vmem:[%s399_s0 + $0xf] sm:$0x1]   ;;  %v214_v18 = vld [vmem:[%s399_s0 + $0xe] sm:$0x1]  }
   0xa   :  { %31 = vrot.lane.b32.xlu0 %v201_v4, %s263_s22  ;;  %37 = vrot.lane.b32.xlu1 %v202_v5, %s264_s23  ;;  %s275_s2 = smov 60   ;;  %s276_s3 = smov 56   ;;  %v215_v19 = vld [vmem:[%s399_s0 + $0xd] sm:$0x1]   ;;  %v216_v20 = vld [vmem:[%s399_s0 + $0xc] sm:$0x1]  }
   0xb   :  { %s278_s9 = smov 48   ;;  %v217_v21 = vld [vmem:[%s399_s0 + $0xb] sm:$0x1]   ;;  %v218_v22 = vld [vmem:[%s399_s0 + $0xa] sm:$0x1]   ;;  %s280_s15 = smov 40  }
   0xc   :  { %v219_v23 = vld [vmem:[%s399_s0 + $0x9] sm:$0x1]   ;;  %v220_v24 = vld [vmem:[%s399_s0 + $0x8] sm:$0x1]   ;;  %s282_s21 = smov 32   ;;  %s284_s27 = smov 24  }
   0xd   :  { %v221_v25 = vld [vmem:[%s399_s0 + $0x7] sm:$0x1]   ;;  %v222_v26 = vld [vmem:[%s399_s0 + $0x6] sm:$0x1]   ;;  %v223_v27 = vld [vmem:[%s399_s0 + $0x5] sm:$0x1]  }
   0xe   :  { %43 = vrot.lane.b32.xlu0 %v203_v6, %s265_s28  ;;  %49 = vrot.lane.b32.xlu1 %v204_v7, %s266_s29  ;;  %v224_v28 = vld [vmem:[%s399_s0 + $0x4] sm:$0x1]   ;;  %s286_s4 = smov 16   ;;  %v225_v29 = vld [vmem:[%s399_s0 + $0x3] sm:$0x1]   ;;  %s288_s10 = smov 8  }
   0xf   :  { %v226_v30 = vld [vmem:[%s399_s0 + $0x2] sm:$0x1]   ;;  %v227_v31 = vld [vmem:[%s399_s0 + $0x1] sm:$0x1]   ;;  %s289_s0 = smov 4   ;;  %vm27_vm4 = vcmask 950144  }
  0x10   :  { %vm33_vm5 = vcmask 917344   ;;  %vm39_vm6 = vcmask 884544   ;;  %vm45_vm7 = vcmask 851744   ;;  %vm51_vm8 = vcmask 818944  }
  0x11   :  { %vm57_vm9 = vcmask 786144   ;;  %vm63_vm10 = vcmask 753344   ;;  %vm69_vm11 = vcmask 720544   ;;  %vm75_vm12 = vcmask 687744  }
  0x12   :  { %55 = vrot.lane.b32.xlu0 %v205_v8, %s267_s7  ;;  %61 = vrot.lane.b32.xlu1 %v206_v9, %s268_s8  ;;  %s277_s8 = smov 52   ;;  %vm81_vm13 = vcmask 654944   ;;  %vm87_vm14 = vcmask 622144   ;;  %vm93_vm15 = vcmask 589344   ;;  %vm99_vm0 = vcmask 556544  }
  0x16   :  { %67 = vrot.lane.b32.xlu0 %v207_v11, %s269_s13  ;;  %73 = vrot.lane.b32.xlu1 %v208_v12, %s270_s14  ;;  %s279_s14 = smov 44  }
  0x1a   :  { %79 = vrot.lane.b32.xlu0 %v209_v13, %s271_s19  ;;  %85 = vrot.lane.b32.xlu1 %v210_v14, %s272_s20  ;;  %s281_s20 = smov 36  }
  0x1e   :  { %91 = vrot.lane.b32.xlu0 %v211_v15, %s273_s25  ;;  %97 = vrot.lane.b32.xlu1 %v212_v16, %s274_s26  ;;  %s283_s26 = smov 28  }
  0x22   :  { %103 = vrot.lane.b32.xlu0 %v213_v17, %s275_s2  ;;  %109 = vrot.lane.b32.xlu1 %v214_v18, %s276_s3  ;;  %s285_s3 = smov 20  }
  0x26   :  { %115 = vrot.lane.b32.xlu0 %v215_v19, %s277_s8  ;;  %121 = vrot.lane.b32.xlu1 %v216_v20, %s278_s9  ;;  %s287_s9 = smov 12  }
  0x2a   :  { %127 = vrot.lane.b32.xlu0 %v217_v21, %s279_s14  ;;  %133 = vrot.lane.b32.xlu1 %v218_v22, %s280_s15 }
  0x2e   :  { %139 = vrot.lane.b32.xlu0 %v219_v23, %s281_s20  ;;  %145 = vrot.lane.b32.xlu1 %v220_v24, %s282_s21 }
  0x32   :  { %151 = vrot.lane.b32.xlu0 %v221_v25, %s283_s26  ;;  %157 = vrot.lane.b32.xlu1 %v222_v26, %s284_s27 }
  0x36   :  { %163 = vrot.lane.b32.xlu0 %v223_v27, %s285_s3  ;;  %169 = vrot.lane.b32.xlu1 %v224_v28, %s286_s4 }
  0x3a   :  { %175 = vrot.lane.b32.xlu0 %v225_v29, %s287_s9  ;;  %181 = vrot.lane.b32.xlu1 %v226_v30, %s288_s10 }
  0x3e   :  { %187 = vrot.lane.b32.xlu0 %v227_v31, %s289_s0 }
  0x74   :  { %v8_v32 = vpop.permute.xlu0 %7   ;;  %v20_v33 = vpop.permute.xlu1 %19  }
  0x75   :  { %10 = vst.msk [vmem:[#allocation0] sm:$0x1] %vm9_vm1, %v8_v32   ;;  %vm105_vm1 = vcmask 523744  }
  0x78   :  { %v14_v34 = vpop.permute.xlu0 %13   ;;  %v26_v35 = vpop.permute.xlu1 %25  }
  0x79   :  { %16 = vst.msk [vmem:[#allocation0] sm:$0x1] %vm15_vm2, %v14_v34   ;;  %vm111_vm2 = vcmask 490944  }
  0x7a   :  { %22 = vst.msk [vmem:[#allocation0] sm:$0x1] %vm21_vm3, %v20_v33   ;;  %vm117_vm3 = vcmask 458144  }
  0x7b   :  { %28 = vst.msk [vmem:[#allocation0] sm:$0x1] %vm27_vm4, %v26_v35   ;;  %vm123_vm4 = vcmask 425344  }
  0x7c   :  { %v32_v36 = vpop.permute.xlu0 %31   ;;  %v38_v37 = vpop.permute.xlu1 %37  }
  0x7d   :  { %34 = vst.msk [vmem:[#allocation0] sm:$0x1] %vm33_vm5, %v32_v36   ;;  %vm129_vm5 = vcmask 392544  }
  0x7e   :  { %40 = vst.msk [vmem:[#allocation0] sm:$0x1] %vm39_vm6, %v38_v37   ;;  %vm135_vm6 = vcmask 359744  }
  0x80   :  { %v44_v38 = vpop.permute.xlu0 %43   ;;  %v50_v39 = vpop.permute.xlu1 %49  }
  0x81   :  { %46 = vst.msk [vmem:[#allocation0] sm:$0x1] %vm45_vm7, %v44_v38   ;;  %vm141_vm7 = vcmask 326944  }
  0x82   :  { %52 = vst.msk [vmem:[#allocation0] sm:$0x1] %vm51_vm8, %v50_v39   ;;  %vm147_vm8 = vcmask 294144  }
  0x84   :  { %v56_v40 = vpop.permute.xlu0 %55   ;;  %v62_v41 = vpop.permute.xlu1 %61  }
  0x85   :  { %58 = vst.msk [vmem:[#allocation0] sm:$0x1] %vm57_vm9, %v56_v40   ;;  %vm153_vm9 = vcmask 261344  }
  0x86   :  { %64 = vst.msk [vmem:[#allocation0] sm:$0x1] %vm63_vm10, %v62_v41   ;;  %vm159_vm10 = vcmask 228544  }
  0x88   :  { %v68_v42 = vpop.permute.xlu0 %67   ;;  %v74_v43 = vpop.permute.xlu1 %73  }
  0x89   :  { %70 = vst.msk [vmem:[#allocation0] sm:$0x1] %vm69_vm11, %v68_v42   ;;  %vm165_vm11 = vcmask 195744  }
  0x8a   :  { %76 = vst.msk [vmem:[#allocation0] sm:$0x1] %vm75_vm12, %v74_v43   ;;  %vm171_vm12 = vcmask 162944  }
  0x8c   :  { %v80_v44 = vpop.permute.xlu0 %79   ;;  %v86_v45 = vpop.permute.xlu1 %85  }
  0x8d   :  { %82 = vst.msk [vmem:[#allocation0] sm:$0x1] %vm81_vm13, %v80_v44   ;;  %vm177_vm13 = vcmask 130144  }
  0x8e   :  { %88 = vst.msk [vmem:[#allocation0] sm:$0x1] %vm87_vm14, %v86_v45   ;;  %vm183_vm14 = vcmask 97344  }
  0x90   :  { %v92_v46 = vpop.permute.xlu0 %91   ;;  %v98_v47 = vpop.permute.xlu1 %97  }
  0x91   :  { %94 = vst.msk [vmem:[#allocation0] sm:$0x1] %vm93_vm15, %v92_v46   ;;  %vm189_vm15 = vcmask 64544  }
  0x92   :  { %100 = vst.msk [vmem:[#allocation0] sm:$0x1] %vm99_vm0, %v98_v47  }
  0x94   :  { %v104_v48 = vpop.permute.xlu0 %103   ;;  %v110_v49 = vpop.permute.xlu1 %109  }
  0x95   :  { %106 = vst.msk [vmem:[#allocation0] sm:$0x1] %vm105_vm1, %v104_v48  }
  0x96   :  { %112 = vst.msk [vmem:[#allocation0] sm:$0x1] %vm111_vm2, %v110_v49  }
  0x98   :  { %v116_v50 = vpop.permute.xlu0 %115   ;;  %v122_v51 = vpop.permute.xlu1 %121  }
  0x99   :  { %118 = vst.msk [vmem:[#allocation0] sm:$0x1] %vm117_vm3, %v116_v50  }
  0x9a   :  { %124 = vst.msk [vmem:[#allocation0] sm:$0x1] %vm123_vm4, %v122_v51  }
  0x9c   :  { %v128_v52 = vpop.permute.xlu0 %127   ;;  %v134_v53 = vpop.permute.xlu1 %133  }
  0x9d   :  { %130 = vst.msk [vmem:[#allocation0] sm:$0x1] %vm129_vm5, %v128_v52  }
  0x9e   :  { %136 = vst.msk [vmem:[#allocation0] sm:$0x1] %vm135_vm6, %v134_v53  }
  0xa0   :  { %v140_v54 = vpop.permute.xlu0 %139   ;;  %v146_v55 = vpop.permute.xlu1 %145  }
  0xa1   :  { %142 = vst.msk [vmem:[#allocation0] sm:$0x1] %vm141_vm7, %v140_v54  }
  0xa2   :  { %148 = vst.msk [vmem:[#allocation0] sm:$0x1] %vm147_vm8, %v146_v55  }
  0xa4   :  { %v152_v56 = vpop.permute.xlu0 %151   ;;  %v158_v57 = vpop.permute.xlu1 %157  }
  0xa5   :  { %154 = vst.msk [vmem:[#allocation0] sm:$0x1] %vm153_vm9, %v152_v56  }
  0xa6   :  { %160 = vst.msk [vmem:[#allocation0] sm:$0x1] %vm159_vm10, %v158_v57  }
  0xa8   :  { %v164_v58 = vpop.permute.xlu0 %163   ;;  %v170_v59 = vpop.permute.xlu1 %169  }
  0xa9   :  { %166 = vst.msk [vmem:[#allocation0] sm:$0x1] %vm165_vm11, %v164_v58  }
  0xaa   :  { %172 = vst.msk [vmem:[#allocation0] sm:$0x1] %vm171_vm12, %v170_v59  }
  0xac   :  { %v176_v60 = vpop.permute.xlu0 %175   ;;  %v182_v61 = vpop.permute.xlu1 %181  }
  0xad   :  { %178 = vst.msk [vmem:[#allocation0] sm:$0x1] %vm177_vm13, %v176_v60  }
  0xae   :  { %184 = vst.msk [vmem:[#allocation0] sm:$0x1] %vm183_vm14, %v182_v61  }
  0xb0   :  { %v188_v62 = vpop.permute.xlu0 %187  }
  0xb1   :  { %190 = vst.msk [vmem:[#allocation0] sm:$0x1] %vm189_vm15, %v188_v62  }
  0xb8   :  { %v194_v63 = vld [vmem:[#allocation0] sm:$0x1] }
  0xb9   :  { %196 = vst [vmem:[%s400_s1] sm:$0x1] %v194_v63 }

// kernel: generator_forward.15
= control target key start
LH: loop header
LB: loop body
LE: loop exit
PB: predicated region body
PF: predicated region fallthrough
CT: control target
= control target key end

     0   :  { %s269_s9 = smov 0   ;;  %s289_s0 = inlined_call_operand.vmem [shape: f32[64,128], index: 0, kind: input, shape index: {}]   ;;  %s290_s1 = inlined_call_operand.vmem [shape: f32[1,128], index: 1, kind: input, shape index: {}]   ;;  %s291_s2 = inlined_call_operand.vmem [shape: f32[64,128], index: 2, kind: output, shape index: {}]  }
   0x1 LB: > { %s226_s10 = sadd.s32 4294967295, %s252_s9   ;;  %p230_p0 = scmp.ge.s32.totalorder %s252_s9, 1  ;;  %s252_s9 = sphi %s269_s9, %s12_s9  }
   0x2   : > { %p113_p1 = scmp.lt.s32.totalorder %s252_s9, 3 }
   0x4   : > { %p114_p2 = pnand %p230_p0, %p113_p1 }
   0x5   : > { %s231_s11 = sshll.u32 (!%p114_p2), %s226_s10, 2  ;;  %v235_v0 = vld [vmem:[%s290_s1] ss:$0 sm:$0xff] (!%p114_p2) }
   0x6   : > { %117 = sbr.rel (%p114_p2) target bundleno = 23 (0x17), region = 28  ;;  %p136_p3 = scmp.lt.s32.totalorder (!%p114_p2), %s231_s11, 7 }
   0xd   : > { %s293_s11 = smov (!%p136_p3, %s231_s11), 7 }
   0xe   : > { %s232_s12 = sshll.u32 %s293_s11, 3 }
   0xf   : > { %s139_s17 = scalar_lea.vmem %s289_s0, %s232_s12  ;;  %s145_s20 = scalar_lea.vmem %s291_s2, %s232_s12 }
  0x10   : > { %v147_v1 = vld [vmem:[%s139_s17] sm:$0xff]  ;;  %v148_v2 = vld [vmem:[%s139_s17 + $0x8] sm:$0xff]  ;;  %v149_v3 = vld [vmem:[%s139_s17 + $0x10] sm:$0xff] }
  0x11   : > { %v158_v4 = vadd.f32 %v235_v0, %v147_v1  ;;  %v159_v5 = vadd.f32 %v235_v0, %v148_v2  ;;  %v160_v6 = vadd.f32 %v235_v0, %v149_v3  ;;  %v150_v7 = vld [vmem:[%s139_s17 + $0x18] sm:$0xff] }
  0x12   : > { %v161_v8 = vadd.f32 %v235_v0, %v150_v7 }
  0x13   : > { %v162_v9 = vmax.f32 %v158_v4, 0.0  ;;  %v163_v10 = vmax.f32 %v159_v5, 0.0  ;;  %v164_v11 = vmax.f32 %v160_v6, 0.0 }
  0x14   : > { %v165_v12 = vmax.f32 %v161_v8, 0.0 }
  0x15   : > { %166 = vst [vmem:[%s145_s20] sm:$0xff] %v162_v9  ;;  %167 = vst [vmem:[%s145_s20 + $0x8] sm:$0xff] %v163_v10 }
  0x16   : > { %168 = vst [vmem:[%s145_s20 + $0x10] sm:$0xff] %v164_v11  ;;  %169 = vst [vmem:[%s145_s20 + $0x18] sm:$0xff] %v165_v12 }
  0x17 PF: > { %s12_s9 = sadd.s32 1, %s252_s9  }
  0x18   : > { %p9_p4 = scmp.ge.s32.totalorder %s12_s9, 4  }
  0x1a   :  { %11 = sbr.rel (!%p9_p4) target bundleno = 1 (0x1), region = 58 }

// kernel: generator_forward.16
= control target key start
LH: loop header
LB: loop body
LE: loop exit
PB: predicated region body
PF: predicated region fallthrough
CT: control target
= control target key end

     0   :  { %s1165_s12 = smov 0   ;;  %s1454_s0 = inlined_call_operand.vmem [shape: bf16[2048,4], index: 0, kind: input, shape index: {}]   ;;  %s1455_s1 = inlined_call_operand.vmem [shape: bf16[4,48], index: 1, kind: input, shape index: {}]   ;;  %s1456_s2 = inlined_call_operand.vmem [shape: f32[1,48], index: 2, kind: input, shape index: {}]   ;;  %s1457_s3 = inlined_call_operand.vmem [shape: f32[2048,48], index: 3, kind: output, shape index: {}]  }
   0x1 LB: > { %s918_s13 = sadd.s32 4294967295, %s1143_s12   ;;  %p922_p0 = scmp.ge.s32.totalorder %s1143_s12, 1  ;;  %s1143_s12 = sphi %s1165_s12, %s13_s12  }
   0x2   : > { %p138_p1 = scmp.lt.s32.totalorder %s1143_s12, 5 }
   0x4   : > { %p139_p2 = pnand %p922_p0, %p138_p1 }
   0x5   : > { %v239_v0 = vld [vmem:[%s1455_s1] sm:$0x3] (!%p139_p2)  ;;  %vm504_vm0 = vcmask (!%p139_p2), 1041408   ;;  %s923_s16 = sshll.u32 (!%p139_p2), %s918_s13, 6  ;;  %vm407_vm1 = vcmask (!%p139_p2), 31744   ;;  %vm797_vm2 = vcmask (!%p139_p2), 392192  }
   0x6   : > { %142 = sbr.rel (%p139_p2) target bundleno = 293 (0x125), region = 32  ;;  %1095 = vmatprep.subr.msk.bf16.mxu0 (!%p139_p2), %vm504_vm0, %v239_v0  ;;  %1096 = vmatprep.subr.msk.bf16.mxu1 (!%p139_p2), %vm504_vm0, %v239_v0  ;;  %v506_v1 = vsel (!%p139_p2), %vm504_vm0, %v239_v0, 0  ;;  %p163_p3 = scmp.lt.s32.totalorder (!%p139_p2), %s923_s16, 255  ;;  %v1252_v34 = vld [vmem:[%s1456_s2] ss:$0 sm:$0xff] (!%p139_p2) }
   0x7   : > { %1028 = vmatpush3.bf16.msra.mxu0 (!%p139_p2), %v506_v1  ;;  %1094 = vmatpush3.bf16.msra.mxu1 (!%p139_p2), %v506_v1 }
   0xd   : > { %s1459_s16 = smov (!%p163_p3, %s923_s16), 255 }
   0xe   : > { %s924_s17 = sshll.u32 %s1459_s16, 2  ;;  %s926_s21 = sshll.u32 %s1459_s16, 3 }
   0xf   : > { %s1182_s20 = scalar_lea.vmem %s1454_s0, %s924_s17  ;;  %s1257_s26 = scalar_lea.vmem %s1457_s3, %s926_s21 }
  0x10   : > { %v1105_v2 = vld [vmem:[%s1182_s20] sm:$0xff]   ;;  %v1107_v4 = vld [vmem:[%s1182_s20 + $0x8] sm:$0xff]   ;;  %v1109_v6 = vld [vmem:[%s1182_s20 + $0x10] sm:$0xff]  }
  0x11   : > { %v1106_v3 = vld [vmem:[%s1182_s20 + $0x80] sm:$0xff]   ;;  %1029 = vmatprep.mubr.msk.bf16.mxu0 %vm407_vm1, %v1105_v2  ;;  %v1108_v5 = vld [vmem:[%s1182_s20 + $0x88] sm:$0xff]   ;;  %v1110_v7 = vld [vmem:[%s1182_s20 + $0x90] sm:$0xff]  }
  0x12   : > { %1061 = vmatprep.mubr.msk.bf16.mxu1 %vm407_vm1, %v1106_v3  ;;  %1030 = vmatmul.mubr.msk.bf16.vlgmr.msra.gmra.mrb[0].mxu0 %vm407_vm1, %v1107_v4  ;;  %v1111_v8 = vld [vmem:[%s1182_s20 + $0x18] sm:$0xff]   ;;  %v1113_v10 = vld [vmem:[%s1182_s20 + $0x20] sm:$0xff]   ;;  %v1115_v12 = vld [vmem:[%s1182_s20 + $0x28] sm:$0xff]  }
  0x13   : > { %1062 = vmatmul.mubr.msk.bf16.vlgmr.msra.gmra.mrb[0].mxu1 %vm407_vm1, %v1108_v5  ;;  %1033 = vmatprep.mubr.msk.bf16.mxu0 %vm407_vm1, %v1109_v6  ;;  %v1112_v9 = vld [vmem:[%s1182_s20 + $0x98] sm:$0xff]   ;;  %v1114_v11 = vld [vmem:[%s1182_s20 + $0xa0] sm:$0xff]   ;;  %v1116_v13 = vld [vmem:[%s1182_s20 + $0xa8] sm:$0xff]  }
  0x14   : > { %1065 = vmatprep.mubr.msk.bf16.mxu1 %vm407_vm1, %v1110_v7  ;;  %v1117_v14 = vld [vmem:[%s1182_s20 + $0x30] sm:$0xff]   ;;  %v1119_v16 = vld [vmem:[%s1182_s20 + $0x38] sm:$0xff]   ;;  %v1121_v18 = vld [vmem:[%s1182_s20 + $0x40] sm:$0xff]  }
  0x15   : > { %v1118_v15 = vld [vmem:[%s1182_s20 + $0xb0] sm:$0xff]   ;;  %v1120_v17 = vld [vmem:[%s1182_s20 + $0xb8] sm:$0xff]   ;;  %v1122_v19 = vld [vmem:[%s1182_s20 + $0xc0] sm:$0xff]  }
  0x16   : > { %v1123_v20 = vld [vmem:[%s1182_s20 + $0x48] sm:$0xff]   ;;  %v1125_v22 = vld [vmem:[%s1182_s20 + $0x50] sm:$0xff]   ;;  %v1127_v24 = vld [vmem:[%s1182_s20 + $0x58] sm:$0xff]  }
  0x17   : > { %v1124_v21 = vld [vmem:[%s1182_s20 + $0xc8] sm:$0xff]   ;;  %v1126_v23 = vld [vmem:[%s1182_s20 + $0xd0] sm:$0xff]   ;;  %v1128_v25 = vld [vmem:[%s1182_s20 + $0xd8] sm:$0xff]  }
  0x18   : > { %v1129_v26 = vld [vmem:[%s1182_s20 + $0x60] sm:$0xff]   ;;  %v1131_v28 = vld [vmem:[%s1182_s20 + $0x68] sm:$0xff]   ;;  %v1133_v30 = vld [vmem:[%s1182_s20 + $0x70] sm:$0xff]  }
  0x19   : > { %v1130_v27 = vld [vmem:[%s1182_s20 + $0xe0] sm:$0xff]   ;;  %v1132_v29 = vld [vmem:[%s1182_s20 + $0xe8] sm:$0xff]   ;;  %v1134_v31 = vld [vmem:[%s1182_s20 + $0xf0] sm:$0xff]  }
  0x1a   : > { %1034 = vmatmul.mubr.msk.bf16.gmra.mrb[4].mxu0 %vm407_vm1, %v1111_v8  ;;  %v1135_v32 = vld [vmem:[%s1182_s20 + $0x78] sm:$0xff]  }
  0x1b   : > { %1066 = vmatmul.mubr.msk.bf16.gmra.mrb[4].mxu1 %vm407_vm1, %v1112_v9  ;;  %1037 = vmatprep.mubr.msk.bf16.mxu0 %vm407_vm1, %v1113_v10  ;;  %v1136_v33 = vld [vmem:[%s1182_s20 + $0xf8] sm:$0xff]  }
  0x1c   : > { %1069 = vmatprep.mubr.msk.bf16.mxu1 %vm407_vm1, %v1114_v11 }
  0x22   : > { %1038 = vmatmul.mubr.msk.bf16.gmra.mrb[8].mxu0 %vm407_vm1, %v1115_v12 }
  0x23   : > { %1070 = vmatmul.mubr.msk.bf16.gmra.mrb[8].mxu1 %vm407_vm1, %v1116_v13  ;;  %1041 = vmatprep.mubr.msk.bf16.mxu0 %vm407_vm1, %v1117_v14 }
  0x24   : > { %1073 = vmatprep.mubr.msk.bf16.mxu1 %vm407_vm1, %v1118_v15 }
  0x2a   : > { %1042 = vmatmul.mubr.msk.bf16.gmra.mrb[12].mxu0 %vm407_vm1, %v1119_v16 }
  0x2b   : > { %1074 = vmatmul.mubr.msk.bf16.gmra.mrb[12].mxu1 %vm407_vm1, %v1120_v17  ;;  %1045 = vmatprep.mubr.msk.bf16.mxu0 %vm407_vm1, %v1121_v18 }
  0x2c   : > { %1077 = vmatprep.mubr.msk.bf16.mxu1 %vm407_vm1, %v1122_v19 }
  0x32   : > { %1046 = vmatmul.mubr.msk.bf16.gmra.mrb[16].mxu0 %vm407_vm1, %v1123_v20 }
  0x33   : > { %1078 = vmatmul.mubr.msk.bf16.gmra.mrb[16].mxu1 %vm407_vm1, %v1124_v21  ;;  %1049 = vmatprep.mubr.msk.bf16.mxu0 %vm407_vm1, %v1125_v22 }
  0x34   : > { %1081 = vmatprep.mubr.msk.bf16.mxu1 %vm407_vm1, %v1126_v23 }
  0x3a   : > { %1050 = vmatmul.mubr.msk.bf16.gmra.mrb[20].mxu0 %vm407_vm1, %v1127_v24 }
  0x3b   : > { %1082 = vmatmul.mubr.msk.bf16.gmra.mrb[20].mxu1 %vm407_vm1, %v1128_v25  ;;  %1053 = vmatprep.mubr.msk.bf16.mxu0 %vm407_vm1, %v1129_v26 }
  0x3c   : > { %1085 = vmatprep.mubr.msk.bf16.mxu1 %vm407_vm1, %v1130_v27 }
  0x42   : > { %1054 = vmatmul.mubr.msk.bf16.gmra.mrb[24].mxu0 %vm407_vm1, %v1131_v28 }
  0x43   : > { %1086 = vmatmul.mubr.msk.bf16.gmra.mrb[24].mxu1 %vm407_vm1, %v1132_v29  ;;  %1057 = vmatprep.mubr.msk.bf16.mxu0 %vm407_vm1, %v1133_v30 }
  0x44   : > { %1089 = vmatprep.mubr.msk.bf16.mxu1 %vm407_vm1, %v1134_v31 }
  0x4a   : > { %1058 = vmatmul.mubr.msk.bf16.gmra.mrb[28].mxu0 %vm407_vm1, %v1135_v32 }
  0x4b   : > { %1090 = vmatmul.mubr.msk.bf16.gmra.mrb[28].mxu1 %vm407_vm1, %v1136_v33 }
  0xe5   : > { %v1031_v35 = vpop.f32.mrb[0].mxu0 }
  0xe6   : > { %v551_v36 = vadd.f32 %v1031_v35, %v1252_v34  ;;  %v1063_v37 = vpop.f32.mrb[0].mxu1  ;;  %v542_v38 = vpop.f32.mrb[1].mxu0 }
  0xe7   : > { %v679_v39 = vadd.f32 %v1063_v37, %v1252_v34  ;;  %v543_v40 = vadd.f32 %v1252_v34, %v542_v38  ;;  %v670_v41 = vpop.f32.mrb[1].mxu1  ;;  %v1032_v42 = vpop.f32.mrb[2].mxu0 }
  0xe8   : > { %800 = vst.msk [vmem:[%s1257_s26 + $0x10] sm:$0xff] %vm797_vm2, %v551_v36  ;;  %v671_v43 = vadd.f32 %v1252_v34, %v670_v41  ;;  %v554_v44 = vadd.f32 %v1032_v42, %v1252_v34  ;;  %v1064_v45 = vpop.f32.mrb[2].mxu1  ;;  %v545_v46 = vpop.f32.mrb[3].mxu0 }
  0xe9   : > { %832 = vst.msk [vmem:[%s1257_s26 + $0x110] sm:$0xff] %vm797_vm2, %v679_v39  ;;  %798 = vst.msk [vmem:[%s1257_s26] sm:$0xff] %vm797_vm2, %v543_v40  ;;  %v682_v47 = vadd.f32 %v1064_v45, %v1252_v34  ;;  %v546_v48 = vadd.f32 %v1252_v34, %v545_v46  ;;  %v673_v49 = vpop.f32.mrb[3].mxu1 }
  0xea   : > { %830 = vst.msk [vmem:[%s1257_s26 + $0x100] sm:$0xff] %vm797_vm2, %v671_v43  ;;  %801 = vst.msk [vmem:[%s1257_s26 + $0x18] sm:$0xff] %vm797_vm2, %v554_v44  ;;  %v674_v50 = vadd.f32 %v1252_v34, %v673_v49 }
  0xeb   : > { %833 = vst.msk [vmem:[%s1257_s26 + $0x118] sm:$0xff] %vm797_vm2, %v682_v47  ;;  %799 = vst.msk [vmem:[%s1257_s26 + $0x8] sm:$0xff] %vm797_vm2, %v546_v48 }
  0xec   : > { %831 = vst.msk [vmem:[%s1257_s26 + $0x108] sm:$0xff] %vm797_vm2, %v674_v50 }
  0xed   : > { %v1035_v51 = vpop.f32.mrb[4].mxu0 }
  0xee   : > { %v567_v52 = vadd.f32 %v1035_v51, %v1252_v34  ;;  %v1067_v53 = vpop.f32.mrb[4].mxu1  ;;  %v558_v54 = vpop.f32.mrb[5].mxu0 }
  0xef   : > { %v695_v55 = vadd.f32 %v1067_v53, %v1252_v34  ;;  %v559_v56 = vadd.f32 %v1252_v34, %v558_v54  ;;  %v686_v57 = vpop.f32.mrb[5].mxu1  ;;  %v1036_v58 = vpop.f32.mrb[6].mxu0 }
  0xf0   : > { %804 = vst.msk [vmem:[%s1257_s26 + $0x30] sm:$0xff] %vm797_vm2, %v567_v52  ;;  %v687_v59 = vadd.f32 %v1252_v34, %v686_v57  ;;  %v570_v60 = vadd.f32 %v1036_v58, %v1252_v34  ;;  %v1068_v61 = vpop.f32.mrb[6].mxu1  ;;  %v561_v62 = vpop.f32.mrb[7].mxu0 }
  0xf1   : > { %836 = vst.msk [vmem:[%s1257_s26 + $0x130] sm:$0xff] %vm797_vm2, %v695_v55  ;;  %802 = vst.msk [vmem:[%s1257_s26 + $0x20] sm:$0xff] %vm797_vm2, %v559_v56  ;;  %v698_v63 = vadd.f32 %v1068_v61, %v1252_v34  ;;  %v562_v0 = vadd.f32 %v1252_v34, %v561_v62  ;;  %v689_v1 = vpop.f32.mrb[7].mxu1 }
  0xf2   : > { %834 = vst.msk [vmem:[%s1257_s26 + $0x120] sm:$0xff] %vm797_vm2, %v687_v59  ;;  %805 = vst.msk [vmem:[%s1257_s26 + $0x38] sm:$0xff] %vm797_vm2, %v570_v60  ;;  %v690_v2 = vadd.f32 %v1252_v34, %v689_v1 }
  0xf3   : > { %837 = vst.msk [vmem:[%s1257_s26 + $0x138] sm:$0xff] %vm797_vm2, %v698_v63  ;;  %803 = vst.msk [vmem:[%s1257_s26 + $0x28] sm:$0xff] %vm797_vm2, %v562_v0 }
  0xf4   : > { %835 = vst.msk [vmem:[%s1257_s26 + $0x128] sm:$0xff] %vm797_vm2, %v690_v2 }
  0xf5   : > { %v1039_v3 = vpop.f32.mrb[8].mxu0 }
  0xf6   : > { %v583_v4 = vadd.f32 %v1039_v3, %v1252_v34  ;;  %v1071_v5 = vpop.f32.mrb[8].mxu1  ;;  %v574_v6 = vpop.f32.mrb[9].mxu0 }
  0xf7   : > { %v711_v7 = vadd.f32 %v1071_v5, %v1252_v34  ;;  %v575_v8 = vadd.f32 %v1252_v34, %v574_v6  ;;  %v702_v9 = vpop.f32.mrb[9].mxu1  ;;  %v1040_v10 = vpop.f32.mrb[10].mxu0 }
  0xf8   : > { %808 = vst.msk [vmem:[%s1257_s26 + $0x50] sm:$0xff] %vm797_vm2, %v583_v4  ;;  %v703_v11 = vadd.f32 %v1252_v34, %v702_v9  ;;  %v586_v12 = vadd.f32 %v1040_v10, %v1252_v34  ;;  %v1072_v13 = vpop.f32.mrb[10].mxu1  ;;  %v577_v14 = vpop.f32.mrb[11].mxu0 }
  0xf9   : > { %840 = vst.msk [vmem:[%s1257_s26 + $0x150] sm:$0xff] %vm797_vm2, %v711_v7  ;;  %806 = vst.msk [vmem:[%s1257_s26 + $0x40] sm:$0xff] %vm797_vm2, %v575_v8  ;;  %v714_v15 = vadd.f32 %v1072_v13, %v1252_v34  ;;  %v578_v16 = vadd.f32 %v1252_v34, %v577_v14  ;;  %v705_v17 = vpop.f32.mrb[11].mxu1 }
  0xfa   : > { %838 = vst.msk [vmem:[%s1257_s26 + $0x140] sm:$0xff] %vm797_vm2, %v703_v11  ;;  %809 = vst.msk [vmem:[%s1257_s26 + $0x58] sm:$0xff] %vm797_vm2, %v586_v12  ;;  %v706_v18 = vadd.f32 %v1252_v34, %v705_v17 }
  0xfb   : > { %841 = vst.msk [vmem:[%s1257_s26 + $0x158] sm:$0xff] %vm797_vm2, %v714_v15  ;;  %807 = vst.msk [vmem:[%s1257_s26 + $0x48] sm:$0xff] %vm797_vm2, %v578_v16 }
  0xfc   : > { %839 = vst.msk [vmem:[%s1257_s26 + $0x148] sm:$0xff] %vm797_vm2, %v706_v18 }
  0xfd   : > { %v1043_v19 = vpop.f32.mrb[12].mxu0 }
  0xfe   : > { %v599_v20 = vadd.f32 %v1043_v19, %v1252_v34  ;;  %v1075_v21 = vpop.f32.mrb[12].mxu1  ;;  %v590_v22 = vpop.f32.mrb[13].mxu0 }
  0xff   : > { %v727_v23 = vadd.f32 %v1075_v21, %v1252_v34  ;;  %v591_v24 = vadd.f32 %v1252_v34, %v590_v22  ;;  %v718_v25 = vpop.f32.mrb[13].mxu1  ;;  %v1044_v26 = vpop.f32.mrb[14].mxu0 }
 0x100   : > { %812 = vst.msk [vmem:[%s1257_s26 + $0x70] sm:$0xff] %vm797_vm2, %v599_v20  ;;  %v719_v27 = vadd.f32 %v1252_v34, %v718_v25  ;;  %v602_v28 = vadd.f32 %v1044_v26, %v1252_v34  ;;  %v1076_v29 = vpop.f32.mrb[14].mxu1  ;;  %v593_v30 = vpop.f32.mrb[15].mxu0 }
 0x101   : > { %844 = vst.msk [vmem:[%s1257_s26 + $0x170] sm:$0xff] %vm797_vm2, %v727_v23  ;;  %810 = vst.msk [vmem:[%s1257_s26 + $0x60] sm:$0xff] %vm797_vm2, %v591_v24  ;;  %v730_v31 = vadd.f32 %v1076_v29, %v1252_v34  ;;  %v594_v32 = vadd.f32 %v1252_v34, %v593_v30  ;;  %v721_v33 = vpop.f32.mrb[15].mxu1 }
 0x102   : > { %842 = vst.msk [vmem:[%s1257_s26 + $0x160] sm:$0xff] %vm797_vm2, %v719_v27  ;;  %813 = vst.msk [vmem:[%s1257_s26 + $0x78] sm:$0xff] %vm797_vm2, %v602_v28  ;;  %v722_v35 = vadd.f32 %v1252_v34, %v721_v33 }
 0x103   : > { %845 = vst.msk [vmem:[%s1257_s26 + $0x178] sm:$0xff] %vm797_vm2, %v730_v31  ;;  %811 = vst.msk [vmem:[%s1257_s26 + $0x68] sm:$0xff] %vm797_vm2, %v594_v32 }
 0x104   : > { %843 = vst.msk [vmem:[%s1257_s26 + $0x168] sm:$0xff] %vm797_vm2, %v722_v35 }
 0x105   : > { %v1047_v36 = vpop.f32.mrb[16].mxu0 }
 0x106   : > { %v615_v37 = vadd.f32 %v1047_v36, %v1252_v34  ;;  %v1079_v38 = vpop.f32.mrb[16].mxu1  ;;  %v606_v39 = vpop.f32.mrb[17].mxu0 }
 0x107   : > { %v743_v40 = vadd.f32 %v1079_v38, %v1252_v34  ;;  %v607_v41 = vadd.f32 %v1252_v34, %v606_v39  ;;  %v734_v42 = vpop.f32.mrb[17].mxu1  ;;  %v1048_v43 = vpop.f32.mrb[18].mxu0 }
 0x108   : > { %816 = vst.msk [vmem:[%s1257_s26 + $0x90] sm:$0xff] %vm797_vm2, %v615_v37  ;;  %v735_v44 = vadd.f32 %v1252_v34, %v734_v42  ;;  %v618_v45 = vadd.f32 %v1048_v43, %v1252_v34  ;;  %v1080_v46 = vpop.f32.mrb[18].mxu1  ;;  %v609_v47 = vpop.f32.mrb[19].mxu0 }
 0x109   : > { %848 = vst.msk [vmem:[%s1257_s26 + $0x190] sm:$0xff] %vm797_vm2, %v743_v40  ;;  %814 = vst.msk [vmem:[%s1257_s26 + $0x80] sm:$0xff] %vm797_vm2, %v607_v41  ;;  %v746_v48 = vadd.f32 %v1080_v46, %v1252_v34  ;;  %v610_v49 = vadd.f32 %v1252_v34, %v609_v47  ;;  %v737_v50 = vpop.f32.mrb[19].mxu1 }
 0x10a   : > { %846 = vst.msk [vmem:[%s1257_s26 + $0x180] sm:$0xff] %vm797_vm2, %v735_v44  ;;  %817 = vst.msk [vmem:[%s1257_s26 + $0x98] sm:$0xff] %vm797_vm2, %v618_v45  ;;  %v738_v51 = vadd.f32 %v1252_v34, %v737_v50 }
 0x10b   : > { %849 = vst.msk [vmem:[%s1257_s26 + $0x198] sm:$0xff] %vm797_vm2, %v746_v48  ;;  %815 = vst.msk [vmem:[%s1257_s26 + $0x88] sm:$0xff] %vm797_vm2, %v610_v49 }
 0x10c   : > { %847 = vst.msk [vmem:[%s1257_s26 + $0x188] sm:$0xff] %vm797_vm2, %v738_v51 }
 0x10d   : > { %v1051_v52 = vpop.f32.mrb[20].mxu0 }
 0x10e   : > { %v631_v53 = vadd.f32 %v1051_v52, %v1252_v34  ;;  %v1083_v54 = vpop.f32.mrb[20].mxu1  ;;  %v622_v55 = vpop.f32.mrb[21].mxu0 }
 0x10f   : > { %v759_v56 = vadd.f32 %v1083_v54, %v1252_v34  ;;  %v623_v57 = vadd.f32 %v1252_v34, %v622_v55  ;;  %v750_v58 = vpop.f32.mrb[21].mxu1  ;;  %v1052_v59 = vpop.f32.mrb[22].mxu0 }
 0x110   : > { %820 = vst.msk [vmem:[%s1257_s26 + $0xb0] sm:$0xff] %vm797_vm2, %v631_v53  ;;  %v751_v60 = vadd.f32 %v1252_v34, %v750_v58  ;;  %v634_v61 = vadd.f32 %v1052_v59, %v1252_v34  ;;  %v1084_v62 = vpop.f32.mrb[22].mxu1  ;;  %v625_v63 = vpop.f32.mrb[23].mxu0 }
 0x111   : > { %852 = vst.msk [vmem:[%s1257_s26 + $0x1b0] sm:$0xff] %vm797_vm2, %v759_v56  ;;  %818 = vst.msk [vmem:[%s1257_s26 + $0xa0] sm:$0xff] %vm797_vm2, %v623_v57  ;;  %v762_v0 = vadd.f32 %v1084_v62, %v1252_v34  ;;  %v626_v1 = vadd.f32 %v1252_v34, %v625_v63  ;;  %v753_v2 = vpop.f32.mrb[23].mxu1 }
 0x112   : > { %850 = vst.msk [vmem:[%s1257_s26 + $0x1a0] sm:$0xff] %vm797_vm2, %v751_v60  ;;  %821 = vst.msk [vmem:[%s1257_s26 + $0xb8] sm:$0xff] %vm797_vm2, %v634_v61  ;;  %v754_v3 = vadd.f32 %v1252_v34, %v753_v2 }
 0x113   : > { %853 = vst.msk [vmem:[%s1257_s26 + $0x1b8] sm:$0xff] %vm797_vm2, %v762_v0  ;;  %819 = vst.msk [vmem:[%s1257_s26 + $0xa8] sm:$0xff] %vm797_vm2, %v626_v1 }
 0x114   : > { %851 = vst.msk [vmem:[%s1257_s26 + $0x1a8] sm:$0xff] %vm797_vm2, %v754_v3 }
 0x115   : > { %v1055_v4 = vpop.f32.mrb[24].mxu0 }
 0x116   : > { %v647_v5 = vadd.f32 %v1055_v4, %v1252_v34  ;;  %v1087_v6 = vpop.f32.mrb[24].mxu1  ;;  %v638_v7 = vpop.f32.mrb[25].mxu0 }
 0x117   : > { %v775_v8 = vadd.f32 %v1087_v6, %v1252_v34  ;;  %v639_v9 = vadd.f32 %v1252_v34, %v638_v7  ;;  %v766_v10 = vpop.f32.mrb[25].mxu1  ;;  %v1056_v11 = vpop.f32.mrb[26].mxu0 }
 0x118   : > { %824 = vst.msk [vmem:[%s1257_s26 + $0xd0] sm:$0xff] %vm797_vm2, %v647_v5  ;;  %v767_v12 = vadd.f32 %v1252_v34, %v766_v10  ;;  %v650_v13 = vadd.f32 %v1056_v11, %v1252_v34  ;;  %v1088_v14 = vpop.f32.mrb[26].mxu1  ;;  %v641_v15 = vpop.f32.mrb[27].mxu0 }
 0x119   : > { %856 = vst.msk [vmem:[%s1257_s26 + $0x1d0] sm:$0xff] %vm797_vm2, %v775_v8  ;;  %822 = vst.msk [vmem:[%s1257_s26 + $0xc0] sm:$0xff] %vm797_vm2, %v639_v9  ;;  %v778_v16 = vadd.f32 %v1088_v14, %v1252_v34  ;;  %v642_v17 = vadd.f32 %v1252_v34, %v641_v15  ;;  %v769_v18 = vpop.f32.mrb[27].mxu1 }
 0x11a   : > { %854 = vst.msk [vmem:[%s1257_s26 + $0x1c0] sm:$0xff] %vm797_vm2, %v767_v12  ;;  %825 = vst.msk [vmem:[%s1257_s26 + $0xd8] sm:$0xff] %vm797_vm2, %v650_v13  ;;  %v770_v19 = vadd.f32 %v1252_v34, %v769_v18 }
 0x11b   : > { %857 = vst.msk [vmem:[%s1257_s26 + $0x1d8] sm:$0xff] %vm797_vm2, %v778_v16  ;;  %823 = vst.msk [vmem:[%s1257_s26 + $0xc8] sm:$0xff] %vm797_vm2, %v642_v17 }
 0x11c   : > { %855 = vst.msk [vmem:[%s1257_s26 + $0x1c8] sm:$0xff] %vm797_vm2, %v770_v19 }
 0x11d   : > { %v1059_v20 = vpop.f32.mrb[28].mxu0 }
 0x11e   : > { %v663_v21 = vadd.f32 %v1059_v20, %v1252_v34  ;;  %v1091_v22 = vpop.f32.mrb[28].mxu1  ;;  %v654_v23 = vpop.f32.mrb[29].mxu0 }
 0x11f   : > { %v791_v24 = vadd.f32 %v1091_v22, %v1252_v34  ;;  %v655_v25 = vadd.f32 %v1252_v34, %v654_v23  ;;  %v782_v26 = vpop.f32.mrb[29].mxu1  ;;  %v1060_v27 = vpop.f32.mrb[30].mxu0 }
 0x120   : > { %828 = vst.msk [vmem:[%s1257_s26 + $0xf0] sm:$0xff] %vm797_vm2, %v663_v21  ;;  %v783_v28 = vadd.f32 %v1252_v34, %v782_v26  ;;  %v666_v29 = vadd.f32 %v1060_v27, %v1252_v34  ;;  %v1092_v30 = vpop.f32.mrb[30].mxu1  ;;  %v657_v31 = vpop.f32.mrb[31].mxu0 }
 0x121   : > { %860 = vst.msk [vmem:[%s1257_s26 + $0x1f0] sm:$0xff] %vm797_vm2, %v791_v24  ;;  %826 = vst.msk [vmem:[%s1257_s26 + $0xe0] sm:$0xff] %vm797_vm2, %v655_v25  ;;  %v794_v32 = vadd.f32 %v1092_v30, %v1252_v34  ;;  %v658_v33 = vadd.f32 %v1252_v34, %v657_v31  ;;  %v785_v35 = vpop.f32.mrb[31].mxu1 }
 0x122   : > { %858 = vst.msk [vmem:[%s1257_s26 + $0x1e0] sm:$0xff] %vm797_vm2, %v783_v28  ;;  %829 = vst.msk [vmem:[%s1257_s26 + $0xf8] sm:$0xff] %vm797_vm2, %v666_v29  ;;  %v786_v36 = vadd.f32 %v1252_v34, %v785_v35 }
 0x123   : > { %861 = vst.msk [vmem:[%s1257_s26 + $0x1f8] sm:$0xff] %vm797_vm2, %v794_v32  ;;  %827 = vst.msk [vmem:[%s1257_s26 + $0xe8] sm:$0xff] %vm797_vm2, %v658_v33 }
 0x124   : > { %859 = vst.msk [vmem:[%s1257_s26 + $0x1e8] sm:$0xff] %vm797_vm2, %v786_v36 }
 0x125 PF: > { %s13_s12 = sadd.s32 1, %s1143_s12  }
 0x126   : > { %p10_p4 = scmp.ge.s32.totalorder %s13_s12, 6  }
 0x128   :  { %12 = sbr.rel (!%p10_p4) target bundleno = 1 (0x1), region = 62 }

// kernel: tile.48
= control target key start
LH: loop header
LB: loop body
LE: loop exit
PB: predicated region body
PF: predicated region fallthrough
CT: control target
= control target key end

     0   :  { %s64_s0 = inlined_call_operand.vmem [shape: f32[3], index: 0, kind: input, shape index: {}]   ;;  %s65_s1 = inlined_call_operand.vmem [shape: f32[64,3], index: 1, kind: output, shape index: {}]  }
   0x1   :  { %v4_v0 = vld [vmem:[%s64_s0] ss:$0 sm:$0xff] }
   0x2   :  { %5 = vst [vmem:[%s65_s1] sm:$0xff] %v4_v0  ;;  %20 = vst [vmem:[%s65_s1 + $0x8] sm:$0xff] %v4_v0 }
   0x3   :  { %21 = vst [vmem:[%s65_s1 + $0x10] sm:$0xff] %v4_v0  ;;  %22 = vst [vmem:[%s65_s1 + $0x18] sm:$0xff] %v4_v0 }
   0x4   :  { %23 = vst [vmem:[%s65_s1 + $0x20] sm:$0xff] %v4_v0  ;;  %24 = vst [vmem:[%s65_s1 + $0x28] sm:$0xff] %v4_v0 }
   0x5   :  { %25 = vst [vmem:[%s65_s1 + $0x30] sm:$0xff] %v4_v0  ;;  %26 = vst [vmem:[%s65_s1 + $0x38] sm:$0xff] %v4_v0 }

// kernel: tile.49
= control target key start
LH: loop header
LB: loop body
LE: loop exit
PB: predicated region body
PF: predicated region fallthrough
CT: control target
= control target key end

     0   :  { %vm9_vm0 = vcmask 15360   ;;  %s550_s12 = smov 126   ;;  %s551_s13 = smov 120   ;;  %vm3_vm1 = vcmask 23552   ;;  %vm13_vm2 = vcmask 7168   ;;  %vm16_vm3 = vcmask 1048560   ;;  %s824_s0 = inlined_call_operand.vmem [shape: f32[64,3], index: 0, kind: input, shape index: {}]   ;;  %s825_s1 = inlined_call_operand.vmem [shape: f32[1,192], index: 1, kind: output, shape index: {}]  }
   0x1   :  { %v422_v0 = vld [vmem:[%s824_s0 + $0x2a] sm:$0x1]   ;;  %v425_v3 = vld [vmem:[%s824_s0 + $0x28] sm:$0x1]   ;;  %v424_v4 = vld [vmem:[%s824_s0 + $0x29] sm:$0x1]  }
   0x2   :  { %v423_v1 = vld [vmem:[%s824_s0 + $0x2a] sm:$0x1]   ;;  %26 = vrot.lane.b32.xlu1 %v425_v3, %s551_s13  ;;  %v426_v5 = vld [vmem:[%s824_s0 + $0x27] sm:$0x1]   ;;  %s552_s18 = smov 123   ;;  %s553_s19 = smov 117  }
   0x3   :  { %v10_v2 = vsel %vm9_vm0, %v423_v1, %v422_v0  ;;  %v427_v6 = vld [vmem:[%s824_s0 + $0x26] sm:$0x1]   ;;  %v428_v7 = vld [vmem:[%s824_s0 + $0x25] sm:$0x1]   ;;  %s554_s24 = smov 114   ;;  %s555_s25 = smov 111  }
   0x4   :  { %11 = vrot.lane.b32.xlu0 %v10_v2, %s550_s12  ;;  %v429_v8 = vld [vmem:[%s824_s0 + $0x24] sm:$0x1]   ;;  %v430_v9 = vld [vmem:[%s824_s0 + $0x23] sm:$0x1]   ;;  %s556_s30 = smov 108   ;;  %s557_s2 = smov 105  }
   0x5   :  { %v431_v10 = vld [vmem:[%s824_s0 + $0x22] sm:$0x1]   ;;  %v432_v11 = vld [vmem:[%s824_s0 + $0x21] sm:$0x1]   ;;  %s558_s7 = smov 102   ;;  %s559_s8 = smov 99  }
   0x6   :  { %32 = vrot.lane.b32.xlu1 %v426_v5, %s553_s19  ;;  %v433_v12 = vld [vmem:[%s824_s0 + $0x20] sm:$0x1]   ;;  %v434_v13 = vld [vmem:[%s824_s0 + $0x1f] sm:$0x1]   ;;  %s560_s13 = smov 96   ;;  %s561_s14 = smov 93  }
   0x7   :  { %v435_v14 = vld [vmem:[%s824_s0 + $0x1e] sm:$0x1]   ;;  %v436_v15 = vld [vmem:[%s824_s0 + $0x1d] sm:$0x1]   ;;  %s562_s19 = smov 90   ;;  %s563_s20 = smov 87  }
   0x8   :  { %20 = vrot.lane.b32.xlu0 %v424_v4, %s552_s18  ;;  %v437_v16 = vld [vmem:[%s824_s0 + $0x1c] sm:$0x1]   ;;  %v438_v17 = vld [vmem:[%s824_s0 + $0x1b] sm:$0x1]   ;;  %v2_v18 = vld [vmem:[%s824_s0] sm:$0x1]  }
   0x9   :  { %s564_s27 = smov 84   ;;  %s565_s28 = smov 81   ;;  %4 = vst.msk [vmem:[#allocation0] sm:$0x1] %vm3_vm1, %v2_v18   ;;  %v439_v19 = vld [vmem:[%s824_s0 + $0x1a] sm:$0x1]  }
   0xa   :  { %44 = vrot.lane.b32.xlu1 %v428_v7, %s555_s25  ;;  %v440_v20 = vld [vmem:[%s824_s0 + $0x19] sm:$0x1]   ;;  %s566_s4 = smov 78   ;;  %s567_s5 = smov 75   ;;  %v441_v21 = vld [vmem:[%s824_s0 + $0x18] sm:$0x1]  }
   0xb   :  { %v442_v22 = vld [vmem:[%s824_s0 + $0x17] sm:$0x1]   ;;  %s568_s10 = smov 72   ;;  %s569_s11 = smov 69   ;;  %v443_v23 = vld [vmem:[%s824_s0 + $0x16] sm:$0x1]  }
   0xc   :  { %38 = vrot.lane.b32.xlu0 %v427_v6, %s554_s24  ;;  %v444_v24 = vld [vmem:[%s824_s0 + $0x15] sm:$0x1]   ;;  %s570_s16 = smov 66   ;;  %s571_s17 = smov 63   ;;  %v445_v25 = vld [vmem:[%s824_s0 + $0x3f] sm:$0x1]  }
   0xd   :  { %v446_v26 = vld [vmem:[%s824_s0 + $0x14] sm:$0x1]   ;;  %s572_s22 = smov 61   ;;  %s573_s23 = smov 60   ;;  %v447_v27 = vld [vmem:[%s824_s0 + $0x3e] sm:$0x1]  }
   0xe   :  { %56 = vrot.lane.b32.xlu1 %v430_v9, %s557_s2  ;;  %v448_v28 = vld [vmem:[%s824_s0 + $0x13] sm:$0x1]   ;;  %s575_s29 = smov 57   ;;  %v449_v29 = vld [vmem:[%s824_s0 + $0x3d] sm:$0x1]   ;;  %s577_s6 = smov 54  }
   0xf   :  { %v450_v30 = vld [vmem:[%s824_s0 + $0x12] sm:$0x1]   ;;  %v451_v31 = vld [vmem:[%s824_s0 + $0x3c] sm:$0x1]   ;;  %v452_v32 = vld [vmem:[%s824_s0 + $0x11] sm:$0x1]  }
  0x10   :  { %50 = vrot.lane.b32.xlu0 %v429_v8, %s556_s30  ;;  %s579_s12 = smov 51   ;;  %v453_v33 = vld [vmem:[%s824_s0 + $0x3b] sm:$0x1]   ;;  %v454_v34 = vld [vmem:[%s824_s0 + $0x10] sm:$0x1]   ;;  %s581_s18 = smov 48  }
  0x11   :  { %v455_v35 = vld [vmem:[%s824_s0 + $0x3a] sm:$0x1]   ;;  %v456_v36 = vld [vmem:[%s824_s0 + $0xf] sm:$0x1]   ;;  %s583_s24 = smov 45   ;;  %s585_s30 = smov 42  }
  0x12   :  { %68 = vrot.lane.b32.xlu1 %v432_v11, %s559_s8  ;;  %v457_v37 = vld [vmem:[%s824_s0 + $0x39] sm:$0x1]   ;;  %v458_v38 = vld [vmem:[%s824_s0 + $0xe] sm:$0x1]   ;;  %v459_v39 = vld [vmem:[%s824_s0 + $0x38] sm:$0x1]  }
  0x13   :  { %v460_v40 = vld [vmem:[%s824_s0 + $0xd] sm:$0x1]   ;;  %v461_v41 = vld [vmem:[%s824_s0 + $0x37] sm:$0x1]   ;;  %v462_v42 = vld [vmem:[%s824_s0 + $0xc] sm:$0x1]  }
  0x14   :  { %62 = vrot.lane.b32.xlu0 %v431_v10, %s558_s7  ;;  %s587_s7 = smov 39   ;;  %v463_v43 = vld [vmem:[%s824_s0 + $0x36] sm:$0x1]   ;;  %v464_v44 = vld [vmem:[%s824_s0 + $0xb] sm:$0x1]   ;;  %s593_s25 = smov 30  }
  0x15   :  { %v465_v45 = vld [vmem:[%s824_s0 + $0x35] sm:$0x1]   ;;  %v466_v46 = vld [vmem:[%s824_s0 + $0xa] sm:$0x1]   ;;  %v467_v47 = vld [vmem:[%s824_s0 + $0x34] sm:$0x1]  }
  0x16   :  { %80 = vrot.lane.b32.xlu1 %v434_v13, %s561_s14  ;;  %v468_v48 = vld [vmem:[%s824_s0 + $0x9] sm:$0x1]   ;;  %s595_s2 = smov 27   ;;  %v469_v49 = vld [vmem:[%s824_s0 + $0x33] sm:$0x1]   ;;  %s597_s8 = smov 24  }
  0x17   :  { %v470_v50 = vld [vmem:[%s824_s0 + $0x8] sm:$0x1]   ;;  %v471_v51 = vld [vmem:[%s824_s0 + $0x32] sm:$0x1]   ;;  %v472_v52 = vld [vmem:[%s824_s0 + $0x7] sm:$0x1]  }
  0x18   :  { %74 = vrot.lane.b32.xlu0 %v433_v12, %s560_s13  ;;  %s589_s13 = smov 36   ;;  %s599_s14 = smov 21   ;;  %v473_v53 = vld [vmem:[%s824_s0 + $0x31] sm:$0x1]   ;;  %v474_v54 = vld [vmem:[%s824_s0 + $0x6] sm:$0x1]  }
  0x19   :  { %v475_v55 = vld [vmem:[%s824_s0 + $0x30] sm:$0x1]   ;;  %v476_v56 = vld [vmem:[%s824_s0 + $0x5] sm:$0x1]   ;;  %s603_s26 = smov 15   ;;  %s605_s3 = smov 12  }
  0x1a   :  { %92 = vrot.lane.b32.xlu1 %v436_v15, %s563_s20  ;;  %s601_s20 = smov 18   ;;  %v477_v57 = vld [vmem:[%s824_s0 + $0x2f] sm:$0x1]   ;;  %v478_v58 = vld [vmem:[%s824_s0 + $0x4] sm:$0x1]   ;;  %s607_s9 = smov 9  }
  0x1b   :  { %v479_v59 = vld [vmem:[%s824_s0 + $0x2e] sm:$0x1]   ;;  %v480_v60 = vld [vmem:[%s824_s0 + $0x3] sm:$0x1]   ;;  %v481_v61 = vld [vmem:[%s824_s0 + $0x2d] sm:$0x1]  }
  0x1c   :  { %86 = vrot.lane.b32.xlu0 %v435_v14, %s562_s19  ;;  %s591_s19 = smov 33   ;;  %v482_v62 = vld [vmem:[%s824_s0 + $0x2] sm:$0x1]   ;;  %vm28_vm4 = vcmask 1007552   ;;  %vm22_vm5 = vcmask 1032152   ;;  %s609_s15 = smov 6  }
  0x1d   :  { %v483_v1 = vld [vmem:[%s824_s0 + $0x2c] sm:$0x1]   ;;  %v484_v2 = vld [vmem:[%s824_s0 + $0x1] sm:$0x1]   ;;  %vm34_vm6 = vcmask 982952   ;;  %vm40_vm7 = vcmask 958352  }
  0x1e   :  { %104 = vrot.lane.b32.xlu1 %v438_v17, %s565_s28  ;;  %s574_s28 = smov 58   ;;  %s611_s21 = smov 3   ;;  %v485_v5 = vld [vmem:[%s824_s0 + $0x2b] sm:$0x1]   ;;  %vm46_vm8 = vcmask 933752   ;;  %vm52_vm9 = vcmask 909152  }
  0x1f   :  { %s612_s0 = smov 1   ;;  %vm58_vm10 = vcmask 884552   ;;  %vm64_vm11 = vcmask 859952   ;;  %vm70_vm12 = vcmask 835352   ;;  %vm76_vm13 = vcmask 810752  }
  0x20   :  { %98 = vrot.lane.b32.xlu0 %v437_v16, %s564_s27  ;;  %vm82_vm14 = vcmask 786152   ;;  %vm88_vm15 = vcmask 761552   ;;  %vm94_vm0 = vcmask 736952   ;;  %vm100_vm1 = vcmask 712352  }
  0x22   :  { %116 = vrot.lane.b32.xlu1 %v440_v20, %s567_s5  ;;  %s576_s5 = smov 55  }
  0x24   :  { %110 = vrot.lane.b32.xlu0 %v439_v19, %s566_s4 }
  0x26   :  { %128 = vrot.lane.b32.xlu1 %v442_v22, %s569_s11  ;;  %s578_s11 = smov 52  }
  0x28   :  { %122 = vrot.lane.b32.xlu0 %v441_v21, %s568_s10 }
  0x2a   :  { %140 = vrot.lane.b32.xlu1 %v444_v24, %s571_s17  ;;  %s580_s17 = smov 49  }
  0x2c   :  { %134 = vrot.lane.b32.xlu0 %v443_v23, %s570_s16 }
  0x2e   :  { %153 = vrot.lane.b32.xlu1 %v446_v26, %s573_s23  ;;  %s582_s23 = smov 46  }
  0x30   :  { %146 = vrot.lane.b32.xlu0 %v445_v25, %s572_s22 }
  0x32   :  { %166 = vrot.lane.b32.xlu1 %v448_v28, %s575_s29  ;;  %s584_s29 = smov 43  }
  0x34   :  { %159 = vrot.lane.b32.xlu0 %v447_v27, %s574_s28 }
  0x36   :  { %179 = vrot.lane.b32.xlu1 %v450_v30, %s577_s6  ;;  %s586_s6 = smov 40  }
  0x38   :  { %172 = vrot.lane.b32.xlu0 %v449_v29, %s576_s5 }
  0x3a   :  { %192 = vrot.lane.b32.xlu1 %v452_v32, %s579_s12  ;;  %s588_s12 = smov 37  }
  0x3c   :  { %185 = vrot.lane.b32.xlu0 %v451_v31, %s578_s11 }
  0x3e   :  { %205 = vrot.lane.b32.xlu1 %v454_v34, %s581_s18  ;;  %s590_s18 = smov 34  }
  0x40   :  { %198 = vrot.lane.b32.xlu0 %v453_v33, %s580_s17 }
  0x42   :  { %218 = vrot.lane.b32.xlu1 %v456_v36, %s583_s24  ;;  %s592_s24 = smov 31  }
  0x44   :  { %211 = vrot.lane.b32.xlu0 %v455_v35, %s582_s23 }
  0x46   :  { %231 = vrot.lane.b32.xlu1 %v458_v38, %s585_s30  ;;  %s594_s30 = smov 28  }
  0x48   :  { %224 = vrot.lane.b32.xlu0 %v457_v37, %s584_s29 }
  0x4a   :  { %244 = vrot.lane.b32.xlu1 %v460_v40, %s587_s7  ;;  %s596_s7 = smov 25  }
  0x4c   :  { %237 = vrot.lane.b32.xlu0 %v459_v39, %s586_s6 }
  0x4e   :  { %257 = vrot.lane.b32.xlu1 %v462_v42, %s589_s13  ;;  %s598_s13 = smov 22  }
  0x50   :  { %250 = vrot.lane.b32.xlu0 %v461_v41, %s588_s12 }
  0x52   :  { %270 = vrot.lane.b32.xlu1 %v464_v44, %s591_s19  ;;  %s600_s19 = smov 19  }
  0x54   :  { %263 = vrot.lane.b32.xlu0 %v463_v43, %s590_s18 }
  0x56   :  { %283 = vrot.lane.b32.xlu1 %v466_v46, %s593_s25  ;;  %s602_s25 = smov 16  }
  0x58   :  { %276 = vrot.lane.b32.xlu0 %v465_v45, %s592_s24 }
  0x5a   :  { %296 = vrot.lane.b32.xlu1 %v468_v48, %s595_s2  ;;  %s604_s2 = smov 13  }
  0x5c   :  { %289 = vrot.lane.b32.xlu0 %v467_v47, %s594_s30 }
  0x5e   :  { %309 = vrot.lane.b32.xlu1 %v470_v50, %s597_s8  ;;  %s606_s8 = smov 10  }
  0x60   :  { %302 = vrot.lane.b32.xlu0 %v469_v49, %s596_s7 }
  0x62   :  { %322 = vrot.lane.b32.xlu1 %v472_v52, %s599_s14  ;;  %s608_s14 = smov 7  }
  0x64   :  { %315 = vrot.lane.b32.xlu0 %v471_v51, %s598_s13 }
  0x66   :  { %335 = vrot.lane.b32.xlu1 %v474_v54, %s601_s20  ;;  %s610_s20 = smov 4  }
  0x68   :  { %328 = vrot.lane.b32.xlu0 %v473_v53, %s600_s19 }
  0x6a   :  { %348 = vrot.lane.b32.xlu1 %v476_v56, %s603_s26 }
  0x6c   :  { %341 = vrot.lane.b32.xlu0 %v475_v55, %s602_s25 }
  0x6e   :  { %361 = vrot.lane.b32.xlu1 %v478_v58, %s605_s3 }
  0x70   :  { %354 = vrot.lane.b32.xlu0 %v477_v57, %s604_s2 }
  0x72   :  { %374 = vrot.lane.b32.xlu1 %v480_v60, %s607_s9 }
  0x74   :  { %367 = vrot.lane.b32.xlu0 %v479_v59, %s606_s8  ;;  %v27_v0 = vpop.permute.xlu1 %26  }
  0x76   :  { %v12_v63 = vpop.permute.xlu0 %11   ;;  %387 = vrot.lane.b32.xlu1 %v482_v62, %s609_s15 }
  0x77   :  { %15 = vst.msk [vmem:[#allocation0 + $0x8] sm:$0x1] %vm13_vm2, %v12_v63   ;;  %vm106_vm2 = vcmask 687752  }
  0x78   :  { %17 = vst.msk [vmem:[#allocation0] sm:$0x1] %vm16_vm3, %v12_v63   ;;  %380 = vrot.lane.b32.xlu0 %v481_v61, %s608_s14  ;;  %v33_v4 = vpop.permute.xlu1 %32   ;;  %vm112_vm3 = vcmask 663152  }
  0x7a   :  { %v21_v3 = vpop.permute.xlu0 %20   ;;  %400 = vrot.lane.b32.xlu1 %v484_v2, %s611_s21 }
  0x7b   :  { %23 = vst.msk [vmem:[#allocation0] sm:$0x1] %vm22_vm5, %v21_v3   ;;  %vm124_vm5 = vcmask 613952  }
  0x7c   :  { %29 = vst.msk [vmem:[#allocation0] sm:$0x1] %vm28_vm4, %v27_v0   ;;  %393 = vrot.lane.b32.xlu0 %v483_v1, %s610_s20  ;;  %v45_v7 = vpop.permute.xlu1 %44   ;;  %vm118_vm4 = vcmask 638552  }
  0x7d   :  { %35 = vst.msk [vmem:[#allocation0] sm:$0x1] %vm34_vm6, %v33_v4   ;;  %vm130_vm6 = vcmask 589352  }
  0x7e   :  { %v39_v6 = vpop.permute.xlu0 %38  }
  0x7f   :  { %41 = vst.msk [vmem:[#allocation0] sm:$0x1] %vm40_vm7, %v39_v6   ;;  %vm136_vm7 = vcmask 564752  }
  0x80   :  { %406 = vrot.lane.b32.xlu0 %v485_v5, %s612_s0  ;;  %47 = vst.msk [vmem:[#allocation0] sm:$0x1] %vm46_vm8, %v45_v7   ;;  %v57_v9 = vpop.permute.xlu1 %56   ;;  %vm142_vm8 = vcmask 540152  }
  0x82   :  { %v51_v8 = vpop.permute.xlu0 %50  }
  0x83   :  { %53 = vst.msk [vmem:[#allocation0] sm:$0x1] %vm52_vm9, %v51_v8   ;;  %vm148_vm9 = vcmask 523752  }
  0x84   :  { %59 = vst.msk [vmem:[#allocation0] sm:$0x1] %vm58_vm10, %v57_v9   ;;  %v69_v11 = vpop.permute.xlu1 %68   ;;  %vm155_vm10 = vcmask 515552  }
  0x86   :  { %v63_v10 = vpop.permute.xlu0 %62  }
  0x87   :  { %65 = vst.msk [vmem:[#allocation0] sm:$0x1] %vm64_vm11, %v63_v10   ;;  %vm161_vm11 = vcmask 499152  }
  0x88   :  { %71 = vst.msk [vmem:[#allocation0] sm:$0x1] %vm70_vm12, %v69_v11   ;;  %v81_v13 = vpop.permute.xlu1 %80   ;;  %vm168_vm12 = vcmask 490952  }
  0x8a   :  { %v75_v12 = vpop.permute.xlu0 %74  }
  0x8b   :  { %77 = vst.msk [vmem:[#allocation0] sm:$0x1] %vm76_vm13, %v75_v12   ;;  %vm174_vm13 = vcmask 474552  }
  0x8c   :  { %83 = vst.msk [vmem:[#allocation0] sm:$0x1] %vm82_vm14, %v81_v13   ;;  %v93_v15 = vpop.permute.xlu1 %92   ;;  %vm181_vm14 = vcmask 466352  }
  0x8e   :  { %v87_v14 = vpop.permute.xlu0 %86  }
  0x8f   :  { %89 = vst.msk [vmem:[#allocation0] sm:$0x1] %vm88_vm15, %v87_v14   ;;  %vm187_vm15 = vcmask 449952  }
  0x90   :  { %95 = vst.msk [vmem:[#allocation0] sm:$0x1] %vm94_vm0, %v93_v15   ;;  %v105_v17 = vpop.permute.xlu1 %104   ;;  %vm194_vm0 = vcmask 441752  }
  0x92   :  { %v99_v16 = vpop.permute.xlu0 %98  }
  0x93   :  { %101 = vst.msk [vmem:[#allocation0] sm:$0x1] %vm100_vm1, %v99_v16   ;;  %vm200_vm1 = vcmask 425352  }
  0x94   :  { %107 = vst.msk [vmem:[#allocation0] sm:$0x1] %vm106_vm2, %v105_v17   ;;  %v117_v19 = vpop.permute.xlu1 %116   ;;  %vm207_vm2 = vcmask 417152  }
  0x96   :  { %v111_v18 = vpop.permute.xlu0 %110  }
  0x97   :  { %113 = vst.msk [vmem:[#allocation0] sm:$0x1] %vm112_vm3, %v111_v18   ;;  %vm213_vm3 = vcmask 400752  }
  0x98   :  { %119 = vst.msk [vmem:[#allocation0] sm:$0x1] %vm118_vm4, %v117_v19   ;;  %v129_v21 = vpop.permute.xlu1 %128   ;;  %vm220_vm4 = vcmask 392552  }
  0x9a   :  { %v123_v20 = vpop.permute.xlu0 %122  }
  0x9b   :  { %125 = vst.msk [vmem:[#allocation0] sm:$0x1] %vm124_vm5, %v123_v20   ;;  %vm226_vm5 = vcmask 376152  }
  0x9c   :  { %131 = vst.msk [vmem:[#allocation0] sm:$0x1] %vm130_vm6, %v129_v21   ;;  %v141_v23 = vpop.permute.xlu1 %140   ;;  %vm233_vm6 = vcmask 367952  }
  0x9e   :  { %v135_v22 = vpop.permute.xlu0 %134  }
  0x9f   :  { %137 = vst.msk [vmem:[#allocation0] sm:$0x1] %vm136_vm7, %v135_v22   ;;  %vm239_vm7 = vcmask 351552  }
  0xa0   :  { %143 = vst.msk [vmem:[#allocation0] sm:$0x1] %vm142_vm8, %v141_v23   ;;  %v154_v25 = vpop.permute.xlu1 %153   ;;  %vm246_vm8 = vcmask 343352  }
  0xa1   :  { %156 = vst.msk [vmem:[#allocation0] sm:$0x1] %vm155_vm10, %v154_v25   ;;  %vm259_vm10 = vcmask 318752  }
  0xa2   :  { %v147_v24 = vpop.permute.xlu0 %146  }
  0xa3   :  { %150 = vst.msk [vmem:[#allocation0 + $0x8] sm:$0x1] %vm148_vm9, %v147_v24   ;;  %vm252_vm9 = vcmask 326952  }
  0xa4   :  { %v167_v27 = vpop.permute.xlu1 %166  }
  0xa5   :  { %169 = vst.msk [vmem:[#allocation0] sm:$0x1] %vm168_vm12, %v167_v27   ;;  %vm272_vm12 = vcmask 294152  }
  0xa6   :  { %v160_v26 = vpop.permute.xlu0 %159  }
  0xa7   :  { %163 = vst.msk [vmem:[#allocation0 + $0x8] sm:$0x1] %vm161_vm11, %v160_v26   ;;  %vm265_vm11 = vcmask 302352  }
  0xa8   :  { %v180_v29 = vpop.permute.xlu1 %179  }
  0xa9   :  { %182 = vst.msk [vmem:[#allocation0] sm:$0x1] %vm181_vm14, %v180_v29   ;;  %vm285_vm14 = vcmask 269552  }
  0xaa   :  { %v173_v28 = vpop.permute.xlu0 %172  }
  0xab   :  { %176 = vst.msk [vmem:[#allocation0 + $0x8] sm:$0x1] %vm174_vm13, %v173_v28   ;;  %vm278_vm13 = vcmask 277752  }
  0xac   :  { %v193_v31 = vpop.permute.xlu1 %192  }
  0xad   :  { %195 = vst.msk [vmem:[#allocation0] sm:$0x1] %vm194_vm0, %v193_v31   ;;  %vm298_vm0 = vcmask 244952  }
  0xae   :  { %v186_v30 = vpop.permute.xlu0 %185  }
  0xaf   :  { %189 = vst.msk [vmem:[#allocation0 + $0x8] sm:$0x1] %vm187_vm15, %v186_v30   ;;  %vm291_vm15 = vcmask 253152  }
  0xb0   :  { %v206_v33 = vpop.permute.xlu1 %205  }
  0xb1   :  { %208 = vst.msk [vmem:[#allocation0] sm:$0x1] %vm207_vm2, %v206_v33   ;;  %vm311_vm2 = vcmask 220352  }
  0xb2   :  { %v199_v32 = vpop.permute.xlu0 %198  }
  0xb3   :  { %202 = vst.msk [vmem:[#allocation0 + $0x8] sm:$0x1] %vm200_vm1, %v199_v32   ;;  %vm304_vm1 = vcmask 228552  }
  0xb4   :  { %v219_v35 = vpop.permute.xlu1 %218  }
  0xb5   :  { %221 = vst.msk [vmem:[#allocation0] sm:$0x1] %vm220_vm4, %v219_v35   ;;  %vm324_vm4 = vcmask 195752  }
  0xb6   :  { %v212_v34 = vpop.permute.xlu0 %211  }
  0xb7   :  { %215 = vst.msk [vmem:[#allocation0 + $0x8] sm:$0x1] %vm213_vm3, %v212_v34   ;;  %vm317_vm3 = vcmask 203952  }
  0xb8   :  { %v232_v37 = vpop.permute.xlu1 %231  }
  0xb9   :  { %234 = vst.msk [vmem:[#allocation0] sm:$0x1] %vm233_vm6, %v232_v37   ;;  %vm337_vm6 = vcmask 171152  }
  0xba   :  { %v225_v36 = vpop.permute.xlu0 %224  }
  0xbb   :  { %228 = vst.msk [vmem:[#allocation0 + $0x8] sm:$0x1] %vm226_vm5, %v225_v36   ;;  %vm330_vm5 = vcmask 179352  }
  0xbc   :  { %v245_v39 = vpop.permute.xlu1 %244  }
  0xbd   :  { %247 = vst.msk [vmem:[#allocation0] sm:$0x1] %vm246_vm8, %v245_v39   ;;  %vm350_vm8 = vcmask 146552  }
  0xbe   :  { %v238_v38 = vpop.permute.xlu0 %237  }
  0xbf   :  { %241 = vst.msk [vmem:[#allocation0 + $0x8] sm:$0x1] %vm239_vm7, %v238_v38   ;;  %vm343_vm7 = vcmask 154752  }
  0xc0   :  { %v258_v41 = vpop.permute.xlu1 %257  }
  0xc1   :  { %260 = vst.msk [vmem:[#allocation0] sm:$0x1] %vm259_vm10, %v258_v41   ;;  %vm363_vm10 = vcmask 121952  }
  0xc2   :  { %v251_v40 = vpop.permute.xlu0 %250  }
  0xc3   :  { %254 = vst.msk [vmem:[#allocation0 + $0x8] sm:$0x1] %vm252_vm9, %v251_v40   ;;  %vm356_vm9 = vcmask 130152  }
  0xc4   :  { %v271_v43 = vpop.permute.xlu1 %270  }
  0xc5   :  { %273 = vst.msk [vmem:[#allocation0] sm:$0x1] %vm272_vm12, %v271_v43   ;;  %vm376_vm12 = vcmask 97352  }
  0xc6   :  { %v264_v42 = vpop.permute.xlu0 %263  }
  0xc7   :  { %267 = vst.msk [vmem:[#allocation0 + $0x8] sm:$0x1] %vm265_vm11, %v264_v42   ;;  %vm369_vm11 = vcmask 105552  }
  0xc8   :  { %v284_v45 = vpop.permute.xlu1 %283  }
  0xc9   :  { %286 = vst.msk [vmem:[#allocation0] sm:$0x1] %vm285_vm14, %v284_v45   ;;  %vm389_vm14 = vcmask 72752  }
  0xca   :  { %v277_v44 = vpop.permute.xlu0 %276  }
  0xcb   :  { %280 = vst.msk [vmem:[#allocation0 + $0x8] sm:$0x1] %vm278_vm13, %v277_v44   ;;  %vm382_vm13 = vcmask 80952  }
  0xcc   :  { %v297_v47 = vpop.permute.xlu1 %296  }
  0xcd   :  { %299 = vst.msk [vmem:[#allocation0] sm:$0x1] %vm298_vm0, %v297_v47   ;;  %vm402_vm0 = vcmask 48152  }
  0xce   :  { %v290_v46 = vpop.permute.xlu0 %289  }
  0xcf   :  { %293 = vst.msk [vmem:[#allocation0 + $0x8] sm:$0x1] %vm291_vm15, %v290_v46   ;;  %vm395_vm15 = vcmask 56352  }
  0xd0   :  { %v310_v49 = vpop.permute.xlu1 %309  }
  0xd1   :  { %312 = vst.msk [vmem:[#allocation0] sm:$0x1] %vm311_vm2, %v310_v49  }
  0xd2   :  { %v303_v48 = vpop.permute.xlu0 %302  }
  0xd3   :  { %306 = vst.msk [vmem:[#allocation0 + $0x8] sm:$0x1] %vm304_vm1, %v303_v48   ;;  %vm408_vm1 = vcmask 31752  }
  0xd4   :  { %v323_v51 = vpop.permute.xlu1 %322  }
  0xd5   :  { %325 = vst.msk [vmem:[#allocation0] sm:$0x1] %vm324_vm4, %v323_v51  }
  0xd6   :  { %v316_v50 = vpop.permute.xlu0 %315  }
  0xd7   :  { %319 = vst.msk [vmem:[#allocation0 + $0x8] sm:$0x1] %vm317_vm3, %v316_v50  }
  0xd8   :  { %v336_v53 = vpop.permute.xlu1 %335  }
  0xd9   :  { %338 = vst.msk [vmem:[#allocation0] sm:$0x1] %vm337_vm6, %v336_v53  }
  0xda   :  { %v329_v52 = vpop.permute.xlu0 %328  }
  0xdb   :  { %332 = vst.msk [vmem:[#allocation0 + $0x8] sm:$0x1] %vm330_vm5, %v329_v52  }
  0xdc   :  { %v349_v55 = vpop.permute.xlu1 %348  }
  0xdd   :  { %351 = vst.msk [vmem:[#allocation0] sm:$0x1] %vm350_vm8, %v349_v55  }
  0xde   :  { %v342_v54 = vpop.permute.xlu0 %341  }
  0xdf   :  { %345 = vst.msk [vmem:[#allocation0 + $0x8] sm:$0x1] %vm343_vm7, %v342_v54  }
  0xe0   :  { %v362_v57 = vpop.permute.xlu1 %361  }
  0xe1   :  { %364 = vst.msk [vmem:[#allocation0] sm:$0x1] %vm363_vm10, %v362_v57  }
  0xe2   :  { %v355_v56 = vpop.permute.xlu0 %354  }
  0xe3   :  { %358 = vst.msk [vmem:[#allocation0 + $0x8] sm:$0x1] %vm356_vm9, %v355_v56  }
  0xe4   :  { %v375_v59 = vpop.permute.xlu1 %374  }
  0xe5   :  { %377 = vst.msk [vmem:[#allocation0] sm:$0x1] %vm376_vm12, %v375_v59  }
  0xe6   :  { %v368_v58 = vpop.permute.xlu0 %367  }
  0xe7   :  { %371 = vst.msk [vmem:[#allocation0 + $0x8] sm:$0x1] %vm369_vm11, %v368_v58  }
  0xe8   :  { %v388_v61 = vpop.permute.xlu1 %387  }
  0xe9   :  { %390 = vst.msk [vmem:[#allocation0] sm:$0x1] %vm389_vm14, %v388_v61  }
  0xea   :  { %v381_v60 = vpop.permute.xlu0 %380  }
  0xeb   :  { %384 = vst.msk [vmem:[#allocation0 + $0x8] sm:$0x1] %vm382_vm13, %v381_v60  }
  0xec   :  { %v401_v63 = vpop.permute.xlu1 %400  }
  0xed   :  { %403 = vst.msk [vmem:[#allocation0] sm:$0x1] %vm402_vm0, %v401_v63  }
  0xee   :  { %v394_v62 = vpop.permute.xlu0 %393  }
  0xef   :  { %397 = vst.msk [vmem:[#allocation0 + $0x8] sm:$0x1] %vm395_vm15, %v394_v62  }
  0xf2   :  { %v407_v0 = vpop.permute.xlu0 %406  }
  0xf3   :  { %410 = vst.msk [vmem:[#allocation0 + $0x8] sm:$0x1] %vm408_vm1, %v407_v0  }
  0xf4   :  { %v414_v1 = vld [vmem:[#allocation0] sm:$0x1] }
  0xf5   :  { %416 = vst [vmem:[%s825_s1] sm:$0x1] %v414_v1 }
  0xfa   :  { %v418_v2 = vld [vmem:[#allocation0 + $0x8] sm:$0x1] }
  0xfb   :  { %486 = vst [vmem:[%s825_s1 + $0x1] sm:$0x1] %v418_v2 }

// kernel: generator_forward.17
= control target key start
LH: loop header
LB: loop body
LE: loop exit
PB: predicated region body
PF: predicated region fallthrough
CT: control target
= control target key end

     0   :  { %s365_s9 = smov 0   ;;  %s436_s0 = inlined_call_operand.vmem [shape: f32[128,192], index: 0, kind: input, shape index: {}]   ;;  %s437_s1 = inlined_call_operand.vmem [shape: f32[1,192], index: 1, kind: input, shape index: {}]   ;;  %s438_s2 = inlined_call_operand.vmem [shape: f32[128,192], index: 2, kind: output, shape index: {}]  }
   0x1 LB: > { %s287_s10 = sadd.s32 4294967295, %s348_s9   ;;  %p291_p0 = scmp.ge.s32.totalorder %s348_s9, 1  ;;  %s348_s9 = sphi %s365_s9, %s12_s9  }
   0x2   : > { %p114_p1 = scmp.lt.s32.totalorder %s348_s9, 3 }
   0x4   : > { %p115_p2 = pnand %p291_p0, %p114_p1 }
   0x5   : > { %s292_s11 = sshll.u32 (!%p115_p2), %s287_s10, 3  ;;  %v170_v0 = vlaneseq (!%p115_p2)  ;;  %v168_v2 = vld [vmem:[%s437_s1] sm:$0x3] (!%p115_p2)  ;;  %vm213_vm0 = vcmask (!%p115_p2), 523264  }
   0x6   : > { %118 = sbr.rel (%p115_p2) target bundleno = 46 (0x2e), region = 28  ;;  %p139_p3 = scmp.lt.s32.totalorder (!%p115_p2), %s292_s11, 15 }
   0x7   : > { %v171_v1 = vshrl.u32 (!%p115_p2), %v170_v0, 7 }
   0x9   : > { %v172_v3 = vsub.s32 (!%p115_p2), 0, %v171_v1  ;;  %v176_v4 = vsub.s32 (!%p115_p2), 1, %v171_v1 }
   0xb   : > { %v173_v5 = vrot.slane (!%p115_p2), %v168_v2, %v172_v3  ;;  %v177_v6 = vrot.slane (!%p115_p2), %v168_v2, %v176_v4 }
   0xd   : > { %s440_s11 = smov (!%p139_p3, %s292_s11), 15 }
   0xe   : > { %s300_s14 = sshll.u32 %s440_s11, 4 }
   0xf   : > { %s384_s17 = scalar_lea.vmem %s436_s0, %s300_s14  ;;  %s406_s20 = scalar_lea.vmem %s438_s2, %s300_s14 }
  0x10   : > { %v152_v7 = vld [vmem:[%s384_s17] sm:$0xff]  ;;  %v153_v8 = vld [vmem:[%s384_s17 + $0x8] sm:$0xff]  ;;  %v154_v9 = vld [vmem:[%s384_s17 + $0x10] sm:$0xff] }
  0x11   : > { %v180_v10 = vadd.f32 %v173_v5, %v152_v7  ;;  %v181_v11 = vadd.f32 %v177_v6, %v153_v8  ;;  %v182_v12 = vadd.f32 %v173_v5, %v154_v9  ;;  %v155_v13 = vld [vmem:[%s384_s17 + $0x18] sm:$0xff]  ;;  %v156_v14 = vld [vmem:[%s384_s17 + $0x20] sm:$0xff]  ;;  %v157_v15 = vld [vmem:[%s384_s17 + $0x28] sm:$0xff] }
  0x12   : > { %v183_v16 = vadd.f32 %v177_v6, %v155_v13  ;;  %v158_v17 = vld [vmem:[%s384_s17 + $0x30] sm:$0xff]  ;;  %v184_v18 = vadd.f32 %v173_v5, %v156_v14  ;;  %v159_v19 = vld [vmem:[%s384_s17 + $0x38] sm:$0xff]  ;;  %v185_v20 = vadd.f32 %v177_v6, %v157_v15  ;;  %v160_v21 = vld [vmem:[%s384_s17 + $0x40] sm:$0xff] }
  0x13   : > { %310 = vtanh.f32 %v180_v10  ;;  %v186_v22 = vadd.f32 %v173_v5, %v158_v17  ;;  %v161_v23 = vld [vmem:[%s384_s17 + $0x48] sm:$0xff]  ;;  %v187_v24 = vadd.f32 %v177_v6, %v159_v19  ;;  %v162_v25 = vld [vmem:[%s384_s17 + $0x50] sm:$0xff]  ;;  %v188_v26 = vadd.f32 %v173_v5, %v160_v21  ;;  %v163_v27 = vld [vmem:[%s384_s17 + $0x58] sm:$0xff] }
  0x14   : > { %312 = vtanh.f32 %v181_v11  ;;  %v189_v28 = vadd.f32 %v177_v6, %v161_v23  ;;  %v164_v29 = vld [vmem:[%s384_s17 + $0x60] sm:$0xff]  ;;  %v190_v30 = vadd.f32 %v173_v5, %v162_v25  ;;  %v165_v31 = vld [vmem:[%s384_s17 + $0x68] sm:$0xff]  ;;  %v191_v32 = vadd.f32 %v177_v6, %v163_v27  ;;  %v166_v33 = vld [vmem:[%s384_s17 + $0x70] sm:$0xff] }
  0x15   : > { %314 = vtanh.f32 %v182_v12  ;;  %v192_v34 = vadd.f32 %v173_v5, %v164_v29  ;;  %v167_v35 = vld [vmem:[%s384_s17 + $0x78] sm:$0xff]  ;;  %v193_v36 = vadd.f32 %v177_v6, %v165_v31  ;;  %v194_v38 = vadd.f32 %v173_v5, %v166_v33 }
  0x16   : > { %316 = vtanh.f32 %v183_v16  ;;  %v195_v40 = vadd.f32 %v177_v6, %v167_v35 }
  0x17   : > { %318 = vtanh.f32 %v184_v18 }
  0x18   : > { %320 = vtanh.f32 %v185_v20 }
  0x19   : > { %322 = vtanh.f32 %v186_v22 }
  0x1a   : > { %324 = vtanh.f32 %v187_v24 }
  0x1b   : > { %326 = vtanh.f32 %v188_v26 }
  0x1c   : > { %328 = vtanh.f32 %v189_v28 }
  0x1d   : > { %v311_v37 = vpop.eup %310  ;;  %330 = vtanh.f32 %v190_v30 }
  0x1e   : > { %v313_v39 = vpop.eup %312  ;;  %212 = vst [vmem:[%s406_s20] sm:$0xff] %v311_v37  ;;  %332 = vtanh.f32 %v191_v32 }
  0x1f   : > { %v315_v41 = vpop.eup %314  ;;  %214 = vst.msk [vmem:[%s406_s20 + $0x8] sm:$0xff] %vm213_vm0, %v313_v39  ;;  %334 = vtanh.f32 %v192_v34 }
  0x20   : > { %v317_v42 = vpop.eup %316  ;;  %215 = vst [vmem:[%s406_s20 + $0x10] sm:$0xff] %v315_v41  ;;  %336 = vtanh.f32 %v193_v36 }
  0x21   : > { %v319_v43 = vpop.eup %318  ;;  %216 = vst.msk [vmem:[%s406_s20 + $0x18] sm:$0xff] %vm213_vm0, %v317_v42  ;;  %338 = vtanh.f32 %v194_v38 }
  0x22   : > { %v321_v44 = vpop.eup %320  ;;  %217 = vst [vmem:[%s406_s20 + $0x20] sm:$0xff] %v319_v43  ;;  %340 = vtanh.f32 %v195_v40 }
  0x23   : > { %v323_v45 = vpop.eup %322  ;;  %218 = vst.msk [vmem:[%s406_s20 + $0x28] sm:$0xff] %vm213_vm0, %v321_v44 }
  0x24   : > { %v325_v46 = vpop.eup %324  ;;  %219 = vst [vmem:[%s406_s20 + $0x30] sm:$0xff] %v323_v45 }
  0x25   : > { %v327_v47 = vpop.eup %326  ;;  %220 = vst.msk [vmem:[%s406_s20 + $0x38] sm:$0xff] %vm213_vm0, %v325_v46 }
  0x26   : > { %v329_v48 = vpop.eup %328  ;;  %221 = vst [vmem:[%s406_s20 + $0x40] sm:$0xff] %v327_v47 }
  0x27   : > { %v331_v49 = vpop.eup %330  ;;  %222 = vst.msk [vmem:[%s406_s20 + $0x48] sm:$0xff] %vm213_vm0, %v329_v48 }
  0x28   : > { %v333_v50 = vpop.eup %332  ;;  %223 = vst [vmem:[%s406_s20 + $0x50] sm:$0xff] %v331_v49 }
  0x29   : > { %v335_v51 = vpop.eup %334  ;;  %224 = vst.msk [vmem:[%s406_s20 + $0x58] sm:$0xff] %vm213_vm0, %v333_v50 }
  0x2a   : > { %v337_v52 = vpop.eup %336  ;;  %225 = vst [vmem:[%s406_s20 + $0x60] sm:$0xff] %v335_v51 }
  0x2b   : > { %v339_v53 = vpop.eup %338  ;;  %226 = vst.msk [vmem:[%s406_s20 + $0x68] sm:$0xff] %vm213_vm0, %v337_v52 }
  0x2c   : > { %v341_v54 = vpop.eup %340  ;;  %227 = vst [vmem:[%s406_s20 + $0x70] sm:$0xff] %v339_v53 }
  0x2d   : > { %228 = vst.msk [vmem:[%s406_s20 + $0x78] sm:$0xff] %vm213_vm0, %v341_v54 }
  0x2e PF: > { %s12_s9 = sadd.s32 1, %s348_s9  }
  0x2f   : > { %p9_p4 = scmp.ge.s32.totalorder %s12_s9, 4  }
  0x31   :  { %11 = sbr.rel (!%p9_p4) target bundleno = 1 (0x1), region = 58 }

</bundles_post_ra>
